<compile_context>
chip_gen: v7x
topology: tpu7x:2x2x1
jax: 0.10.0
libtpu: 0.0.40
codegen_flags: <defaults>
</compile_context>

<pallas_src>
import functools
import math

import jax
import jax.numpy as jnp
from jax import lax
from jax.experimental import pallas as pl
from jax.experimental.pallas import tpu as pltpu


# ----------------------------- Fused kernel --------------------------------

def _fused_mha_kernel(xq_ref, xk_ref, xv_ref,
                      wq_ref, wk_ref, wv_ref, wo_ref, bo_ref,
                      o_ref, *, num_heads, head_size):
    """One batch block per grid step: projections + attention + out-proj."""
    f32 = jnp.float32
    cd = wq_ref.dtype                       # matmul-operand dtype (f32 or bf16)
    H, d = num_heads, head_size
    bt, Sq, Dq = xq_ref.shape
    _, Sk, Din = xk_ref.shape

    # q/k/v projections on the flattened (bt*Sq, D) slabs: bigger MXU M dim,
    # lane-dense H*d outputs, f32 accumulation.  The 1/sqrt(d) softmax scale is
    # already folded into wq (done once at parameter init).
    q = jnp.dot(xq_ref[...].reshape(bt * Sq, Dq), wq_ref[...],
                preferred_element_type=f32)
    k = jnp.dot(xk_ref[...].reshape(bt * Sk, Din), wk_ref[...],
                preferred_element_type=f32)
    v = jnp.dot(xv_ref[...].reshape(bt * Sk, Din), wv_ref[...],
                preferred_element_type=f32)

    # Attention.  NOTE: head_size < 128 under-fills the MXU here; only a
    # model-level change (padded / grouped heads) can fix that.
    rows = []
    for b in range(bt):                      # static unroll; bt kept small
        # Casts to the compute dtype happen only at matmul-operand boundaries.
        qb = q[b * Sq:(b + 1) * Sq, :].astype(cd)
        kb = k[b * Sk:(b + 1) * Sk, :].astype(cd)
        vb = v[b * Sk:(b + 1) * Sk, :].astype(cd)
        heads = []
        # TODO(synk): for large num_heads switch to a head-major batched
        #             formulation / lax.fori_loop to bound vreg live ranges.
        for h in range(H):
            sl = slice(h * d, (h + 1) * d)
            # QK^T without an explicit transpose: contract over d on both sides.
            s = lax.dot_general(qb[:, sl], kb[:, sl],
                                (((1,), (1,)), ((), ())),
                                preferred_element_type=f32)        # (Sq, Sk) f32
            # TODO(synk): optional attention mask would be applied to `s` here.
            m = jnp.max(s, axis=-1, keepdims=True)
            p = jnp.exp(s - m)
            p = p * pl.reciprocal(jnp.sum(p, axis=-1, keepdims=True), approx=True)
            heads.append(jnp.dot(p.astype(cd), vb[:, sl],
                                 preferred_element_type=f32))      # (Sq, d) f32
        # Lane-dense head concat built in registers: no VMEM scratch, no masked
        # partial (lane-sparse) stores.
        rows.append(heads[0] if H == 1 else jnp.concatenate(heads, axis=-1))
    concat = rows[0] if bt == 1 else jnp.concatenate(rows, axis=0)  # (bt*Sq, H*d)

    # Output projection + bias on the whole slab (single MXU pass, contraction
    # over H*d), then one full-block store.
    out = jnp.dot(concat.astype(cd), wo_ref[...], preferred_element_type=f32)
    out = out + bo_ref[...].astype(f32)                             # (1, out) bcast
    o_ref[...] = out.reshape(bt, Sq, out.shape[-1]).astype(o_ref.dtype)


# ----------------------------- Host wrapper --------------------------------

def fused_mha(query, key, value, wq_scaled, wk, wv, wo, bo, *,
              num_heads, head_size, compute_dtype=jnp.float32, out_dtype=None):
    """query: (B, Sq, Dq); key/value: (B, Sk, Din) -> (B, Sq, out_size).

    `wq_scaled` must already contain the 1/sqrt(head_size) softmax scale.
    """
    B, Sq, Dq = query.shape
    _, Sk, Din = key.shape
    HD = num_heads * head_size
    out_size = wo.shape[1]
    out_dtype = query.dtype if out_dtype is None else out_dtype

    cd = jnp.dtype(compute_dtype)
    itc = cd.itemsize
    out_itc = jnp.dtype(out_dtype).itemsize

    # ---- generation-aware VMEM budget (v5e/v6e 128 MiB, v7x 64 MiB/TC) ----
    try:
        vmem_cap = int(pltpu.get_tpu_info().vmem_capacity_bytes)
    except Exception:
        vmem_cap = 64 << 20                      # conservative: v7x per-TC VMEM
    budget = (vmem_cap * 3) // 4                 # ~25% headroom for compiler scratch

    weight_bytes = (Dq * HD + 2 * Din * HD + HD * out_size) * itc + out_size * 4

    def need_bytes(bt, weight_bufs=2):
        act_in = bt * (Sq * Dq + 2 * Sk * Din) * itc          # input blocks
        act_out = bt * Sq * out_size * out_itc                 # output block
        # In-kernel working set: q/k/v slabs (f32 + cd copies), score tile,
        # head concat + out-proj result (f32).
        work = (bt * (Sq + 2 * Sk) * HD * (4 + itc)
                + bt * Sq * Sk * 4 + bt * Sq * (HD + out_size) * 4)
        return 2 * (act_in + act_out) + weight_bufs * weight_bytes + work + (2 << 20)

    # ---- batch-block size: amortize per-step overhead, stay in budget ----
    divisors = [dv for dv in range(1, B + 1) if B % dv == 0]
    target_rows = 256                            # MXU-friendly M dim (v6e/v7x)
    bt = 1
    for dv in divisors:
        if dv * max(Sq, Sk) <= max(target_rows, Sq, Sk) and need_bytes(dv) <= budget:
            bt = dv
    # Keep >= 2 grid steps when possible: both v7x TensorCores get work and the
    # BlockSpec pipeline can overlap DMA with compute.
    while bt > 1 and (B // bt) < 2:
        bt = max(dv for dv in divisors if dv < bt)

    cp_kwargs = dict(dimension_semantics=("parallel",))
    need = need_bytes(bt)
    if need > (16 << 20):   # smallest default scoped limit (v5e 16 MiB; v6e/v7x 32 MiB)
        cp_kwargs["vmem_limit_bytes"] = int(max(min(need, budget), 16 << 20))

    # Cast matmul operands once outside the kernel (halves HBM->VMEM bytes in
    # bf16 mode); bias stays f32 and is added in f32 inside the kernel.
    query_c, key_c, value_c = (x.astype(cd) for x in (query, key, value))
    wq_c, wk_c, wv_c, wo_c = (w.astype(cd) for w in (wq_scaled, wk, wv, wo))
    bo_2d = bo.reshape(1, out_size).astype(jnp.float32)

    kernel = functools.partial(_fused_mha_kernel, num_heads=num_heads,
                               head_size=head_size)

    def build(single_buffer_weights):
        def wspec(shape):
            kw = {}
            if single_buffer_weights:
                # Constant-index blocks are never re-fetched: single-buffer them
                # so they don't occupy 2x VMEM (matters on v7x's 64 MiB).
                kw["pipeline_mode"] = pl.Buffered(1)
            return pl.BlockSpec(shape, lambda i: (0,) * len(shape), **kw)

        in_specs = [
            pl.BlockSpec((bt, Sq, Dq), lambda i: (i, 0, 0)),     # query block
            pl.BlockSpec((bt, Sk, Din), lambda i: (i, 0, 0)),    # key block
            pl.BlockSpec((bt, Sk, Din), lambda i: (i, 0, 0)),    # value block
            wspec((Dq, HD)),                                     # wq (resident)
            wspec((Din, HD)),                                    # wk (resident)
            wspec((Din, HD)),                                    # wv (resident)
            wspec((HD, out_size)),                               # wo (resident)
            wspec((1, out_size)),                                # bias (resident)
        ]
        # TODO(synk): if out_size % 128 != 0 the output store is a narrow masked
        #             vst; only fixable by padding out_size at the model level.
        return pl.pallas_call(
            kernel,
            out_shape=jax.ShapeDtypeStruct((B, Sq, out_size), out_dtype),
            grid=(B // bt,),
            in_specs=in_specs,
            out_specs=pl.BlockSpec((bt, Sq, out_size), lambda i: (i, 0, 0)),
            compiler_params=pltpu.CompilerParams(**cp_kwargs),
        )

    args = (query_c, key_c, value_c, wq_c, wk_c, wv_c, wo_c, bo_2d)
    try:
        return build(True)(*args)
    except Exception:
        # Fallback for environments where pl.Buffered(1) on resident blocks is
        # not available: identical kernel with default double buffering.
        return build(False)(*args)


# ----------------------------- Module wrapper -------------------------------

class MultiHeadAttentionPallas:
    def __init__(self, in_size, num_heads, head_size, out_size,
                 query_in_size=None, *, key, compute_dtype=jnp.float32):
        self.in_size = in_size
        self.num_heads = num_heads
        self.head_size = head_size
        self.out_size = out_size
        self.query_in_size = query_in_size if query_in_size is not None else in_size
        self.compute_dtype = compute_dtype
        hd = num_heads * head_size

        k1, k2, k3, k4, k5 = jax.random.split(key, 5)

        def init_linear(k, fan_in, fan_out):
            # Matches torch nn.Linear default init (uniform +-1/sqrt(fan_in));
            # stored as (fan_in, fan_out) so forward is x @ W.
            bound = 1.0 / math.sqrt(fan_in)
            return jax.random.uniform(k, (fan_in, fan_out), jnp.float32, -bound, bound)

        self.q_w = init_linear(k1, self.query_in_size, hd)
        self.k_w = init_linear(k2, in_size, hd)
        self.v_w = init_linear(k3, in_size, hd)
        self.o_w = init_linear(k4, hd, out_size)
        bound = 1.0 / math.sqrt(hd)
        self.o_b = jax.random.uniform(k5, (out_size,), jnp.float32, -bound, bound)

        # Fold the softmax 1/sqrt(head_size) scale into the query projection once
        # at init (one-time parameter transform; removes a per-step VPU multiply).
        self._q_w_scaled = self.q_w * (1.0 / math.sqrt(head_size))

        # TODO(synk): when key is value (shared KV input), wk/wv could be
        #             concatenated into one (in, 2*H*d) weight and projected with
        #             a single MXU pass and a single KV input DMA stream.

    def __call__(self, query, key, value, mask=None, compute_dtype=None):
        # TODO(synk): mask (masked_fill) path not implemented; it belongs on the
        #             (Sq, Sk) score tile before the max/exp inside the kernel.
        assert mask is None
        cd = self.compute_dtype if compute_dtype is None else compute_dtype
        return fused_mha(query, key, value,
                         self._q_w_scaled, self.k_w, self.v_w, self.o_w, self.o_b,
                         num_heads=self.num_heads, head_size=self.head_size,
                         compute_dtype=cd, out_dtype=query.dtype)


# Pure-JAX reference for correctness checking (mirrors the PyTorch forward).
def reference_mha(mod, query, key, value):
    B, Sq, _ = query.shape
    Sk = key.shape[1]
    H, d = mod.num_heads, mod.head_size
    q = (query @ mod.q_w).reshape(B, Sq, H, d).transpose(0, 2, 1, 3)
    k = (key @ mod.k_w).reshape(B, Sk, H, d).transpose(0, 2, 1, 3)
    v = (value @ mod.v_w).reshape(B, Sk, H, d).transpose(0, 2, 1, 3)
    rel = jnp.einsum("bhqd,bhkd->bhqk", q, k) / math.sqrt(d)
    rel = jax.nn.softmax(rel, axis=-1)
    head = jnp.einsum("bhqk,bhkd->bhqd", rel, v)
    out = head.transpose(0, 2, 1, 3).reshape(B, Sq, H * d)
    return out @ mod.o_w + mod.o_b


if __name__ == "__main__":
    # Small shapes consistent with the module's forward (batch=4 so the
    # batch-blocked path with bt>1 AND a multi-step grid are both exercised).
    batch, seq_q, seq_kv = 4, 8, 8
    in_size, num_heads, head_size, out_size = 32, 4, 8, 32

    root = jax.random.PRNGKey(0)
    k_params, k_q, k_k, k_v = jax.random.split(root, 4)

    mha = MultiHeadAttentionPallas(in_size, num_heads, head_size, out_size,
                                   key=k_params)

    query = jax.random.normal(k_q, (batch, seq_q, in_size), jnp.float32)
    key_ = jax.random.normal(k_k, (batch, seq_kv, in_size), jnp.float32)
    value = jax.random.normal(k_v, (batch, seq_kv, in_size), jnp.float32)

    ref = reference_mha(mha, query, key_, value)

    # f32 compute path (approx EUP reciprocal in the softmax -> slightly
    # loosened tolerance vs. the exact reference).
    out_f32 = jax.block_until_ready(mha(query, key_, value))
    assert out_f32.shape == (batch, seq_q, out_size)
    err_f32 = float(jnp.max(jnp.abs(out_f32 - ref)))
    assert jnp.allclose(out_f32, ref, atol=2e-2, rtol=2e-2), err_f32

    # bf16 matmul-operand path (f32 accumulation / softmax / bias).
    out_bf16 = jax.block_until_ready(
        mha(query, key_, value, compute_dtype=jnp.bfloat16))
    assert out_bf16.shape == (batch, seq_q, out_size)
    err_bf16 = float(jnp.max(jnp.abs(out_bf16 - ref)))
    assert jnp.allclose(out_bf16, ref, atol=5e-2, rtol=5e-2), err_bf16

    print("KERNEL_OK")
</pallas_src>

<mosaic_0001>
module attributes {stable_mosaic.version = 11 : i64} {
  func.func @_fused_mha_kernel(%arg0: i32, %arg1: memref<2x8x32xf32, #tpu.memory_space<vmem>>, %arg2: memref<2x8x32xf32, #tpu.memory_space<vmem>>, %arg3: memref<2x8x32xf32, #tpu.memory_space<vmem>>, %arg4: memref<32x32xf32, #tpu.memory_space<vmem>>, %arg5: memref<32x32xf32, #tpu.memory_space<vmem>>, %arg6: memref<32x32xf32, #tpu.memory_space<vmem>>, %arg7: memref<32x32xf32, #tpu.memory_space<vmem>>, %arg8: memref<1x32xf32, #tpu.memory_space<vmem>>, %arg9: memref<2x8x32xf32, #tpu.memory_space<vmem>>) attributes {dimension_semantics = [#tpu.dimension_semantics<parallel>], iteration_bounds = array<i64: 2>, scalar_prefetch = 0 : i64, scratch_operands = 0 : i64, tpu.core_type = #tpu.core_type<tc>, window_params = [{transform_indices = @transform_0, window_bounds = array<i64: 2, 8, 32>}, {transform_indices = @transform_1, window_bounds = array<i64: 2, 8, 32>}, {transform_indices = @transform_2, window_bounds = array<i64: 2, 8, 32>}, {pipeline_mode = #tpu.pipeline_mode<synchronous>, transform_indices = @transform_3, window_bounds = array<i64: 32, 32>}, {pipeline_mode = #tpu.pipeline_mode<synchronous>, transform_indices = @transform_4, window_bounds = array<i64: 32, 32>}, {pipeline_mode = #tpu.pipeline_mode<synchronous>, transform_indices = @transform_5, window_bounds = array<i64: 32, 32>}, {pipeline_mode = #tpu.pipeline_mode<synchronous>, transform_indices = @transform_6, window_bounds = array<i64: 32, 32>}, {pipeline_mode = #tpu.pipeline_mode<synchronous>, transform_indices = @transform_7, window_bounds = array<i64: 1, 32>}, {transform_indices = @transform_8, window_bounds = array<i64: 2, 8, 32>}]} {
    %c0 = arith.constant 0 : index
    %c0_0 = arith.constant 0 : index
    %c0_1 = arith.constant 0 : index
    %0 = vector.load %arg1[%c0, %c0_0, %c0_1] : memref<2x8x32xf32, #tpu.memory_space<vmem>>, vector<2x8x32xf32>
    %1 = vector.shape_cast %0 : vector<2x8x32xf32> to vector<16x32xf32>
    %c0_2 = arith.constant 0 : index
    %c0_3 = arith.constant 0 : index
    %2 = vector.load %arg4[%c0_2, %c0_3] : memref<32x32xf32, #tpu.memory_space<vmem>>, vector<32x32xf32>
    %cst = arith.constant dense<0.000000e+00> : vector<16x32xf32>
    %3 = tpu.matmul %1, %2, %cst {dimension_numbers = #tpu.dot_dimension_numbers<[1], [0], [0], [1], [0, 0, 1, 1], [], []>} : vector<16x32xf32>, vector<32x32xf32>, vector<16x32xf32> -> vector<16x32xf32>
    %c0_4 = arith.constant 0 : index
    %c0_5 = arith.constant 0 : index
    %c0_6 = arith.constant 0 : index
    %4 = vector.load %arg2[%c0_4, %c0_5, %c0_6] : memref<2x8x32xf32, #tpu.memory_space<vmem>>, vector<2x8x32xf32>
    %5 = vector.shape_cast %4 : vector<2x8x32xf32> to vector<16x32xf32>
    %c0_7 = arith.constant 0 : index
    %c0_8 = arith.constant 0 : index
    %6 = vector.load %arg5[%c0_7, %c0_8] : memref<32x32xf32, #tpu.memory_space<vmem>>, vector<32x32xf32>
    %cst_9 = arith.constant dense<0.000000e+00> : vector<16x32xf32>
    %7 = tpu.matmul %5, %6, %cst_9 {dimension_numbers = #tpu.dot_dimension_numbers<[1], [0], [0], [1], [0, 0, 1, 1], [], []>} : vector<16x32xf32>, vector<32x32xf32>, vector<16x32xf32> -> vector<16x32xf32>
    %c0_10 = arith.constant 0 : index
    %c0_11 = arith.constant 0 : index
    %c0_12 = arith.constant 0 : index
    %8 = vector.load %arg3[%c0_10, %c0_11, %c0_12] : memref<2x8x32xf32, #tpu.memory_space<vmem>>, vector<2x8x32xf32>
    %9 = vector.shape_cast %8 : vector<2x8x32xf32> to vector<16x32xf32>
    %c0_13 = arith.constant 0 : index
    %c0_14 = arith.constant 0 : index
    %10 = vector.load %arg6[%c0_13, %c0_14] : memref<32x32xf32, #tpu.memory_space<vmem>>, vector<32x32xf32>
    %cst_15 = arith.constant dense<0.000000e+00> : vector<16x32xf32>
    %11 = tpu.matmul %9, %10, %cst_15 {dimension_numbers = #tpu.dot_dimension_numbers<[1], [0], [0], [1], [0, 0, 1, 1], [], []>} : vector<16x32xf32>, vector<32x32xf32>, vector<16x32xf32> -> vector<16x32xf32>
    %12 = vector.extract_strided_slice %3 {offsets = [0, 0], sizes = [8, 32], strides = [1, 1]} : vector<16x32xf32> to vector<8x32xf32>
    %13 = vector.extract_strided_slice %7 {offsets = [0, 0], sizes = [8, 32], strides = [1, 1]} : vector<16x32xf32> to vector<8x32xf32>
    %14 = vector.extract_strided_slice %11 {offsets = [0, 0], sizes = [8, 32], strides = [1, 1]} : vector<16x32xf32> to vector<8x32xf32>
    %15 = vector.extract_strided_slice %12 {offsets = [0, 0], sizes = [8, 8], strides = [1, 1]} : vector<8x32xf32> to vector<8x8xf32>
    %16 = vector.extract_strided_slice %13 {offsets = [0, 0], sizes = [8, 8], strides = [1, 1]} : vector<8x32xf32> to vector<8x8xf32>
    %cst_16 = arith.constant dense<0.000000e+00> : vector<8x8xf32>
    %17 = tpu.matmul %15, %16, %cst_16 {dimension_numbers = #tpu.dot_dimension_numbers<[1], [1], [0], [0], [0, 0, 1, 0], [], []>} : vector<8x8xf32>, vector<8x8xf32>, vector<8x8xf32> -> vector<8x8xf32>
    %cst_17 = arith.constant dense<0xFF800000> : vector<8xf32>
    %18 = vector.multi_reduction <maximumf>, %17, %cst_17 [1] : vector<8x8xf32> to vector<8xf32>
    %19 = vector.shape_cast %18 : vector<8xf32> to vector<8x1xf32>
    %20 = vector.broadcast %19 : vector<8x1xf32> to vector<8x8xf32>
    %21 = arith.subf %17, %20 : vector<8x8xf32>
    %22 = math.exp %21 : vector<8x8xf32>
    %cst_18 = arith.constant dense<0.000000e+00> : vector<8xf32>
    %23 = vector.multi_reduction <add>, %22, %cst_18 [1] : vector<8x8xf32> to vector<8xf32>
    %24 = vector.shape_cast %23 : vector<8xf32> to vector<8x1xf32>
    %25 = tpu.reciprocal %24 {approx = true} : vector<8x1xf32> -> vector<8x1xf32>
    %26 = vector.broadcast %25 : vector<8x1xf32> to vector<8x8xf32>
    %27 = arith.mulf %22, %26 : vector<8x8xf32>
    %28 = vector.extract_strided_slice %14 {offsets = [0, 0], sizes = [8, 8], strides = [1, 1]} : vector<8x32xf32> to vector<8x8xf32>
    %cst_19 = arith.constant dense<0.000000e+00> : vector<8x8xf32>
    %29 = tpu.matmul %27, %28, %cst_19 {dimension_numbers = #tpu.dot_dimension_numbers<[1], [0], [0], [1], [0, 0, 1, 1], [], []>} : vector<8x8xf32>, vector<8x8xf32>, vector<8x8xf32> -> vector<8x8xf32>
    %30 = vector.extract_strided_slice %12 {offsets = [0, 8], sizes = [8, 8], strides = [1, 1]} : vector<8x32xf32> to vector<8x8xf32>
    %31 = vector.extract_strided_slice %13 {offsets = [0, 8], sizes = [8, 8], strides = [1, 1]} : vector<8x32xf32> to vector<8x8xf32>
    %cst_20 = arith.constant dense<0.000000e+00> : vector<8x8xf32>
    %32 = tpu.matmul %30, %31, %cst_20 {dimension_numbers = #tpu.dot_dimension_numbers<[1], [1], [0], [0], [0, 0, 1, 0], [], []>} : vector<8x8xf32>, vector<8x8xf32>, vector<8x8xf32> -> vector<8x8xf32>
    %cst_21 = arith.constant dense<0xFF800000> : vector<8xf32>
    %33 = vector.multi_reduction <maximumf>, %32, %cst_21 [1] : vector<8x8xf32> to vector<8xf32>
    %34 = vector.shape_cast %33 : vector<8xf32> to vector<8x1xf32>
    %35 = vector.broadcast %34 : vector<8x1xf32> to vector<8x8xf32>
    %36 = arith.subf %32, %35 : vector<8x8xf32>
    %37 = math.exp %36 : vector<8x8xf32>
    %cst_22 = arith.constant dense<0.000000e+00> : vector<8xf32>
    %38 = vector.multi_reduction <add>, %37, %cst_22 [1] : vector<8x8xf32> to vector<8xf32>
    %39 = vector.shape_cast %38 : vector<8xf32> to vector<8x1xf32>
    %40 = tpu.reciprocal %39 {approx = true} : vector<8x1xf32> -> vector<8x1xf32>
    %41 = vector.broadcast %40 : vector<8x1xf32> to vector<8x8xf32>
    %42 = arith.mulf %37, %41 : vector<8x8xf32>
    %43 = vector.extract_strided_slice %14 {offsets = [0, 8], sizes = [8, 8], strides = [1, 1]} : vector<8x32xf32> to vector<8x8xf32>
    %cst_23 = arith.constant dense<0.000000e+00> : vector<8x8xf32>
    %44 = tpu.matmul %42, %43, %cst_23 {dimension_numbers = #tpu.dot_dimension_numbers<[1], [0], [0], [1], [0, 0, 1, 1], [], []>} : vector<8x8xf32>, vector<8x8xf32>, vector<8x8xf32> -> vector<8x8xf32>
    %45 = vector.extract_strided_slice %12 {offsets = [0, 16], sizes = [8, 8], strides = [1, 1]} : vector<8x32xf32> to vector<8x8xf32>
    %46 = vector.extract_strided_slice %13 {offsets = [0, 16], sizes = [8, 8], strides = [1, 1]} : vector<8x32xf32> to vector<8x8xf32>
    %cst_24 = arith.constant dense<0.000000e+00> : vector<8x8xf32>
    %47 = tpu.matmul %45, %46, %cst_24 {dimension_numbers = #tpu.dot_dimension_numbers<[1], [1], [0], [0], [0, 0, 1, 0], [], []>} : vector<8x8xf32>, vector<8x8xf32>, vector<8x8xf32> -> vector<8x8xf32>
    %cst_25 = arith.constant dense<0xFF800000> : vector<8xf32>
    %48 = vector.multi_reduction <maximumf>, %47, %cst_25 [1] : vector<8x8xf32> to vector<8xf32>
    %49 = vector.shape_cast %48 : vector<8xf32> to vector<8x1xf32>
    %50 = vector.broadcast %49 : vector<8x1xf32> to vector<8x8xf32>
    %51 = arith.subf %47, %50 : vector<8x8xf32>
    %52 = math.exp %51 : vector<8x8xf32>
    %cst_26 = arith.constant dense<0.000000e+00> : vector<8xf32>
    %53 = vector.multi_reduction <add>, %52, %cst_26 [1] : vector<8x8xf32> to vector<8xf32>
    %54 = vector.shape_cast %53 : vector<8xf32> to vector<8x1xf32>
    %55 = tpu.reciprocal %54 {approx = true} : vector<8x1xf32> -> vector<8x1xf32>
    %56 = vector.broadcast %55 : vector<8x1xf32> to vector<8x8xf32>
    %57 = arith.mulf %52, %56 : vector<8x8xf32>
    %58 = vector.extract_strided_slice %14 {offsets = [0, 16], sizes = [8, 8], strides = [1, 1]} : vector<8x32xf32> to vector<8x8xf32>
    %cst_27 = arith.constant dense<0.000000e+00> : vector<8x8xf32>
    %59 = tpu.matmul %57, %58, %cst_27 {dimension_numbers = #tpu.dot_dimension_numbers<[1], [0], [0], [1], [0, 0, 1, 1], [], []>} : vector<8x8xf32>, vector<8x8xf32>, vector<8x8xf32> -> vector<8x8xf32>
    %60 = vector.extract_strided_slice %12 {offsets = [0, 24], sizes = [8, 8], strides = [1, 1]} : vector<8x32xf32> to vector<8x8xf32>
    %61 = vector.extract_strided_slice %13 {offsets = [0, 24], sizes = [8, 8], strides = [1, 1]} : vector<8x32xf32> to vector<8x8xf32>
    %cst_28 = arith.constant dense<0.000000e+00> : vector<8x8xf32>
    %62 = tpu.matmul %60, %61, %cst_28 {dimension_numbers = #tpu.dot_dimension_numbers<[1], [1], [0], [0], [0, 0, 1, 0], [], []>} : vector<8x8xf32>, vector<8x8xf32>, vector<8x8xf32> -> vector<8x8xf32>
    %cst_29 = arith.constant dense<0xFF800000> : vector<8xf32>
    %63 = vector.multi_reduction <maximumf>, %62, %cst_29 [1] : vector<8x8xf32> to vector<8xf32>
    %64 = vector.shape_cast %63 : vector<8xf32> to vector<8x1xf32>
    %65 = vector.broadcast %64 : vector<8x1xf32> to vector<8x8xf32>
    %66 = arith.subf %62, %65 : vector<8x8xf32>
    %67 = math.exp %66 : vector<8x8xf32>
    %cst_30 = arith.constant dense<0.000000e+00> : vector<8xf32>
    %68 = vector.multi_reduction <add>, %67, %cst_30 [1] : vector<8x8xf32> to vector<8xf32>
    %69 = vector.shape_cast %68 : vector<8xf32> to vector<8x1xf32>
    %70 = tpu.reciprocal %69 {approx = true} : vector<8x1xf32> -> vector<8x1xf32>
    %71 = vector.broadcast %70 : vector<8x1xf32> to vector<8x8xf32>
    %72 = arith.mulf %67, %71 : vector<8x8xf32>
    %73 = vector.extract_strided_slice %14 {offsets = [0, 24], sizes = [8, 8], strides = [1, 1]} : vector<8x32xf32> to vector<8x8xf32>
    %cst_31 = arith.constant dense<0.000000e+00> : vector<8x8xf32>
    %74 = tpu.matmul %72, %73, %cst_31 {dimension_numbers = #tpu.dot_dimension_numbers<[1], [0], [0], [1], [0, 0, 1, 1], [], []>} : vector<8x8xf32>, vector<8x8xf32>, vector<8x8xf32> -> vector<8x8xf32>
    %75 = tpu.concatenate %29, %44, %59, %74 in 1 : vector<8x8xf32>, vector<8x8xf32>, vector<8x8xf32>, vector<8x8xf32> -> vector<8x32xf32>
    %76 = vector.extract_strided_slice %3 {offsets = [8, 0], sizes = [8, 32], strides = [1, 1]} : vector<16x32xf32> to vector<8x32xf32>
    %77 = vector.extract_strided_slice %7 {offsets = [8, 0], sizes = [8, 32], strides = [1, 1]} : vector<16x32xf32> to vector<8x32xf32>
    %78 = vector.extract_strided_slice %11 {offsets = [8, 0], sizes = [8, 32], strides = [1, 1]} : vector<16x32xf32> to vector<8x32xf32>
    %79 = vector.extract_strided_slice %76 {offsets = [0, 0], sizes = [8, 8], strides = [1, 1]} : vector<8x32xf32> to vector<8x8xf32>
    %80 = vector.extract_strided_slice %77 {offsets = [0, 0], sizes = [8, 8], strides = [1, 1]} : vector<8x32xf32> to vector<8x8xf32>
    %cst_32 = arith.constant dense<0.000000e+00> : vector<8x8xf32>
    %81 = tpu.matmul %79, %80, %cst_32 {dimension_numbers = #tpu.dot_dimension_numbers<[1], [1], [0], [0], [0, 0, 1, 0], [], []>} : vector<8x8xf32>, vector<8x8xf32>, vector<8x8xf32> -> vector<8x8xf32>
    %cst_33 = arith.constant dense<0xFF800000> : vector<8xf32>
    %82 = vector.multi_reduction <maximumf>, %81, %cst_33 [1] : vector<8x8xf32> to vector<8xf32>
    %83 = vector.shape_cast %82 : vector<8xf32> to vector<8x1xf32>
    %84 = vector.broadcast %83 : vector<8x1xf32> to vector<8x8xf32>
    %85 = arith.subf %81, %84 : vector<8x8xf32>
    %86 = math.exp %85 : vector<8x8xf32>
    %cst_34 = arith.constant dense<0.000000e+00> : vector<8xf32>
    %87 = vector.multi_reduction <add>, %86, %cst_34 [1] : vector<8x8xf32> to vector<8xf32>
    %88 = vector.shape_cast %87 : vector<8xf32> to vector<8x1xf32>
    %89 = tpu.reciprocal %88 {approx = true} : vector<8x1xf32> -> vector<8x1xf32>
    %90 = vector.broadcast %89 : vector<8x1xf32> to vector<8x8xf32>
    %91 = arith.mulf %86, %90 : vector<8x8xf32>
    %92 = vector.extract_strided_slice %78 {offsets = [0, 0], sizes = [8, 8], strides = [1, 1]} : vector<8x32xf32> to vector<8x8xf32>
    %cst_35 = arith.constant dense<0.000000e+00> : vector<8x8xf32>
    %93 = tpu.matmul %91, %92, %cst_35 {dimension_numbers = #tpu.dot_dimension_numbers<[1], [0], [0], [1], [0, 0, 1, 1], [], []>} : vector<8x8xf32>, vector<8x8xf32>, vector<8x8xf32> -> vector<8x8xf32>
    %94 = vector.extract_strided_slice %76 {offsets = [0, 8], sizes = [8, 8], strides = [1, 1]} : vector<8x32xf32> to vector<8x8xf32>
    %95 = vector.extract_strided_slice %77 {offsets = [0, 8], sizes = [8, 8], strides = [1, 1]} : vector<8x32xf32> to vector<8x8xf32>
    %cst_36 = arith.constant dense<0.000000e+00> : vector<8x8xf32>
    %96 = tpu.matmul %94, %95, %cst_36 {dimension_numbers = #tpu.dot_dimension_numbers<[1], [1], [0], [0], [0, 0, 1, 0], [], []>} : vector<8x8xf32>, vector<8x8xf32>, vector<8x8xf32> -> vector<8x8xf32>
    %cst_37 = arith.constant dense<0xFF800000> : vector<8xf32>
    %97 = vector.multi_reduction <maximumf>, %96, %cst_37 [1] : vector<8x8xf32> to vector<8xf32>
    %98 = vector.shape_cast %97 : vector<8xf32> to vector<8x1xf32>
    %99 = vector.broadcast %98 : vector<8x1xf32> to vector<8x8xf32>
    %100 = arith.subf %96, %99 : vector<8x8xf32>
    %101 = math.exp %100 : vector<8x8xf32>
    %cst_38 = arith.constant dense<0.000000e+00> : vector<8xf32>
    %102 = vector.multi_reduction <add>, %101, %cst_38 [1] : vector<8x8xf32> to vector<8xf32>
    %103 = vector.shape_cast %102 : vector<8xf32> to vector<8x1xf32>
    %104 = tpu.reciprocal %103 {approx = true} : vector<8x1xf32> -> vector<8x1xf32>
    %105 = vector.broadcast %104 : vector<8x1xf32> to vector<8x8xf32>
    %106 = arith.mulf %101, %105 : vector<8x8xf32>
    %107 = vector.extract_strided_slice %78 {offsets = [0, 8], sizes = [8, 8], strides = [1, 1]} : vector<8x32xf32> to vector<8x8xf32>
    %cst_39 = arith.constant dense<0.000000e+00> : vector<8x8xf32>
    %108 = tpu.matmul %106, %107, %cst_39 {dimension_numbers = #tpu.dot_dimension_numbers<[1], [0], [0], [1], [0, 0, 1, 1], [], []>} : vector<8x8xf32>, vector<8x8xf32>, vector<8x8xf32> -> vector<8x8xf32>
    %109 = vector.extract_strided_slice %76 {offsets = [0, 16], sizes = [8, 8], strides = [1, 1]} : vector<8x32xf32> to vector<8x8xf32>
    %110 = vector.extract_strided_slice %77 {offsets = [0, 16], sizes = [8, 8], strides = [1, 1]} : vector<8x32xf32> to vector<8x8xf32>
    %cst_40 = arith.constant dense<0.000000e+00> : vector<8x8xf32>
    %111 = tpu.matmul %109, %110, %cst_40 {dimension_numbers = #tpu.dot_dimension_numbers<[1], [1], [0], [0], [0, 0, 1, 0], [], []>} : vector<8x8xf32>, vector<8x8xf32>, vector<8x8xf32> -> vector<8x8xf32>
    %cst_41 = arith.constant dense<0xFF800000> : vector<8xf32>
    %112 = vector.multi_reduction <maximumf>, %111, %cst_41 [1] : vector<8x8xf32> to vector<8xf32>
    %113 = vector.shape_cast %112 : vector<8xf32> to vector<8x1xf32>
    %114 = vector.broadcast %113 : vector<8x1xf32> to vector<8x8xf32>
    %115 = arith.subf %111, %114 : vector<8x8xf32>
    %116 = math.exp %115 : vector<8x8xf32>
    %cst_42 = arith.constant dense<0.000000e+00> : vector<8xf32>
    %117 = vector.multi_reduction <add>, %116, %cst_42 [1] : vector<8x8xf32> to vector<8xf32>
    %118 = vector.shape_cast %117 : vector<8xf32> to vector<8x1xf32>
    %119 = tpu.reciprocal %118 {approx = true} : vector<8x1xf32> -> vector<8x1xf32>
    %120 = vector.broadcast %119 : vector<8x1xf32> to vector<8x8xf32>
    %121 = arith.mulf %116, %120 : vector<8x8xf32>
    %122 = vector.extract_strided_slice %78 {offsets = [0, 16], sizes = [8, 8], strides = [1, 1]} : vector<8x32xf32> to vector<8x8xf32>
    %cst_43 = arith.constant dense<0.000000e+00> : vector<8x8xf32>
    %123 = tpu.matmul %121, %122, %cst_43 {dimension_numbers = #tpu.dot_dimension_numbers<[1], [0], [0], [1], [0, 0, 1, 1], [], []>} : vector<8x8xf32>, vector<8x8xf32>, vector<8x8xf32> -> vector<8x8xf32>
    %124 = vector.extract_strided_slice %76 {offsets = [0, 24], sizes = [8, 8], strides = [1, 1]} : vector<8x32xf32> to vector<8x8xf32>
    %125 = vector.extract_strided_slice %77 {offsets = [0, 24], sizes = [8, 8], strides = [1, 1]} : vector<8x32xf32> to vector<8x8xf32>
    %cst_44 = arith.constant dense<0.000000e+00> : vector<8x8xf32>
    %126 = tpu.matmul %124, %125, %cst_44 {dimension_numbers = #tpu.dot_dimension_numbers<[1], [1], [0], [0], [0, 0, 1, 0], [], []>} : vector<8x8xf32>, vector<8x8xf32>, vector<8x8xf32> -> vector<8x8xf32>
    %cst_45 = arith.constant dense<0xFF800000> : vector<8xf32>
    %127 = vector.multi_reduction <maximumf>, %126, %cst_45 [1] : vector<8x8xf32> to vector<8xf32>
    %128 = vector.shape_cast %127 : vector<8xf32> to vector<8x1xf32>
    %129 = vector.broadcast %128 : vector<8x1xf32> to vector<8x8xf32>
    %130 = arith.subf %126, %129 : vector<8x8xf32>
    %131 = math.exp %130 : vector<8x8xf32>
    %cst_46 = arith.constant dense<0.000000e+00> : vector<8xf32>
    %132 = vector.multi_reduction <add>, %131, %cst_46 [1] : vector<8x8xf32> to vector<8xf32>
    %133 = vector.shape_cast %132 : vector<8xf32> to vector<8x1xf32>
    %134 = tpu.reciprocal %133 {approx = true} : vector<8x1xf32> -> vector<8x1xf32>
    %135 = vector.broadcast %134 : vector<8x1xf32> to vector<8x8xf32>
    %136 = arith.mulf %131, %135 : vector<8x8xf32>
    %137 = vector.extract_strided_slice %78 {offsets = [0, 24], sizes = [8, 8], strides = [1, 1]} : vector<8x32xf32> to vector<8x8xf32>
    %cst_47 = arith.constant dense<0.000000e+00> : vector<8x8xf32>
    %138 = tpu.matmul %136, %137, %cst_47 {dimension_numbers = #tpu.dot_dimension_numbers<[1], [0], [0], [1], [0, 0, 1, 1], [], []>} : vector<8x8xf32>, vector<8x8xf32>, vector<8x8xf32> -> vector<8x8xf32>
    %139 = tpu.concatenate %93, %108, %123, %138 in 1 : vector<8x8xf32>, vector<8x8xf32>, vector<8x8xf32>, vector<8x8xf32> -> vector<8x32xf32>
    %140 = tpu.concatenate %75, %139 in 0 : vector<8x32xf32>, vector<8x32xf32> -> vector<16x32xf32>
    %c0_48 = arith.constant 0 : index
    %c0_49 = arith.constant 0 : index
    %141 = vector.load %arg7[%c0_48, %c0_49] : memref<32x32xf32, #tpu.memory_space<vmem>>, vector<32x32xf32>
    %cst_50 = arith.constant dense<0.000000e+00> : vector<16x32xf32>
    %142 = tpu.matmul %140, %141, %cst_50 {dimension_numbers = #tpu.dot_dimension_numbers<[1], [0], [0], [1], [0, 0, 1, 1], [], []>} : vector<16x32xf32>, vector<32x32xf32>, vector<16x32xf32> -> vector<16x32xf32>
    %c0_51 = arith.constant 0 : index
    %c0_52 = arith.constant 0 : index
    %143 = vector.load %arg8[%c0_51, %c0_52] : memref<1x32xf32, #tpu.memory_space<vmem>>, vector<1x32xf32>
    %144 = vector.broadcast %143 : vector<1x32xf32> to vector<16x32xf32>
    %145 = arith.addf %142, %144 : vector<16x32xf32>
    %146 = vector.shape_cast %145 : vector<16x32xf32> to vector<2x8x32xf32>
    %c0_53 = arith.constant 0 : index
    %c0_54 = arith.constant 0 : index
    %c0_55 = arith.constant 0 : index
    %147 = vector.load %arg9[%c0_53, %c0_54, %c0_55] : memref<2x8x32xf32, #tpu.memory_space<vmem>>, vector<2x8x32xf32>
    tpu.vector_store %arg9[%c0_53, %c0_54, %c0_55], %146 {strides = array<i32>} : memref<2x8x32xf32, #tpu.memory_space<vmem>>, vector<2x8x32xf32>,
    return
  }
  func.func @transform_0(%arg0: i32) -> (i32, i32, i32) {
    %c0_i32 = arith.constant 0 : i32
    %c0_i32_0 = arith.constant 0 : i32
    %c0_i32_1 = arith.constant 0 : i32
    return %arg0, %c0_i32, %c0_i32_0 : i32, i32, i32
  }
  func.func @transform_1(%arg0: i32) -> (i32, i32, i32) {
    %c0_i32 = arith.constant 0 : i32
    %c0_i32_0 = arith.constant 0 : i32
    %c0_i32_1 = arith.constant 0 : i32
    return %arg0, %c0_i32, %c0_i32_0 : i32, i32, i32
  }
  func.func @transform_2(%arg0: i32) -> (i32, i32, i32) {
    %c0_i32 = arith.constant 0 : i32
    %c0_i32_0 = arith.constant 0 : i32
    %c0_i32_1 = arith.constant 0 : i32
    return %arg0, %c0_i32, %c0_i32_0 : i32, i32, i32
  }
  func.func @transform_3(%arg0: i32) -> (i32, i32) {
    %c0_i32 = arith.constant 0 : i32
    %c0_i32_0 = arith.constant 0 : i32
    %c0_i32_1 = arith.constant 0 : i32
    return %c0_i32, %c0_i32_0 : i32, i32
  }
  func.func @transform_4(%arg0: i32) -> (i32, i32) {
    %c0_i32 = arith.constant 0 : i32
    %c0_i32_0 = arith.constant 0 : i32
    %c0_i32_1 = arith.constant 0 : i32
    return %c0_i32, %c0_i32_0 : i32, i32
  }
  func.func @transform_5(%arg0: i32) -> (i32, i32) {
    %c0_i32 = arith.constant 0 : i32
    %c0_i32_0 = arith.constant 0 : i32
    %c0_i32_1 = arith.constant 0 : i32
    return %c0_i32, %c0_i32_0 : i32, i32
  }
  func.func @transform_6(%arg0: i32) -> (i32, i32) {
    %c0_i32 = arith.constant 0 : i32
    %c0_i32_0 = arith.constant 0 : i32
    %c0_i32_1 = arith.constant 0 : i32
    return %c0_i32, %c0_i32_0 : i32, i32
  }
  func.func @transform_7(%arg0: i32) -> (i32, i32) {
    %c0_i32 = arith.constant 0 : i32
    %c0_i32_0 = arith.constant 0 : i32
    %c0_i32_1 = arith.constant 0 : i32
    return %c0_i32, %c0_i32_0 : i32, i32
  }
  func.func @transform_8(%arg0: i32) -> (i32, i32, i32) {
    %c0_i32 = arith.constant 0 : i32
    %c0_i32_0 = arith.constant 0 : i32
    %c0_i32_1 = arith.constant 0 : i32
    return %arg0, %c0_i32, %c0_i32_0 : i32, i32, i32
  }
}

module attributes {stable_mosaic.version = 11 : i64} {
  func.func @_fused_mha_kernel(%arg0: i32, %arg1: memref<2x8x32xf32, #tpu.memory_space<vmem>>, %arg2: memref<2x8x32xf32, #tpu.memory_space<vmem>>, %arg3: memref<2x8x32xf32, #tpu.memory_space<vmem>>, %arg4: memref<32x32xf32, #tpu.memory_space<vmem>>, %arg5: memref<32x32xf32, #tpu.memory_space<vmem>>, %arg6: memref<32x32xf32, #tpu.memory_space<vmem>>, %arg7: memref<32x32xf32, #tpu.memory_space<vmem>>, %arg8: memref<1x32xf32, #tpu.memory_space<vmem>>, %arg9: memref<2x8x32xf32, #tpu.memory_space<vmem>>) attributes {dimension_semantics = [#tpu.dimension_semantics<parallel>], iteration_bounds = array<i64: 2>, scalar_prefetch = 0 : i64, scratch_operands = 0 : i64, tpu.core_type = #tpu.core_type<tc>, window_params = [{transform_indices = @transform_0, window_bounds = array<i64: 2, 8, 32>}, {transform_indices = @transform_1, window_bounds = array<i64: 2, 8, 32>}, {transform_indices = @transform_2, window_bounds = array<i64: 2, 8, 32>}, {pipeline_mode = #tpu.pipeline_mode<synchronous>, transform_indices = @transform_3, window_bounds = array<i64: 32, 32>}, {pipeline_mode = #tpu.pipeline_mode<synchronous>, transform_indices = @transform_4, window_bounds = array<i64: 32, 32>}, {pipeline_mode = #tpu.pipeline_mode<synchronous>, transform_indices = @transform_5, window_bounds = array<i64: 32, 32>}, {pipeline_mode = #tpu.pipeline_mode<synchronous>, transform_indices = @transform_6, window_bounds = array<i64: 32, 32>}, {pipeline_mode = #tpu.pipeline_mode<synchronous>, transform_indices = @transform_7, window_bounds = array<i64: 1, 32>}, {transform_indices = @transform_8, window_bounds = array<i64: 2, 8, 32>}]} {
    %c0 = arith.constant 0 : index
    %c0_0 = arith.constant 0 : index
    %c0_1 = arith.constant 0 : index
    %0 = vector.load %arg1[%c0, %c0_0, %c0_1] : memref<2x8x32xf32, #tpu.memory_space<vmem>>, vector<2x8x32xf32>
    %1 = vector.shape_cast %0 : vector<2x8x32xf32> to vector<16x32xf32>
    %c0_2 = arith.constant 0 : index
    %c0_3 = arith.constant 0 : index
    %2 = vector.load %arg4[%c0_2, %c0_3] : memref<32x32xf32, #tpu.memory_space<vmem>>, vector<32x32xf32>
    %cst = arith.constant dense<0.000000e+00> : vector<16x32xf32>
    %3 = tpu.matmul %1, %2, %cst {dimension_numbers = #tpu.dot_dimension_numbers<[1], [0], [0], [1], [0, 0, 1, 1], [], []>} : vector<16x32xf32>, vector<32x32xf32>, vector<16x32xf32> -> vector<16x32xf32>
    %c0_4 = arith.constant 0 : index
    %c0_5 = arith.constant 0 : index
    %c0_6 = arith.constant 0 : index
    %4 = vector.load %arg2[%c0_4, %c0_5, %c0_6] : memref<2x8x32xf32, #tpu.memory_space<vmem>>, vector<2x8x32xf32>
    %5 = vector.shape_cast %4 : vector<2x8x32xf32> to vector<16x32xf32>
    %c0_7 = arith.constant 0 : index
    %c0_8 = arith.constant 0 : index
    %6 = vector.load %arg5[%c0_7, %c0_8] : memref<32x32xf32, #tpu.memory_space<vmem>>, vector<32x32xf32>
    %cst_9 = arith.constant dense<0.000000e+00> : vector<16x32xf32>
    %7 = tpu.matmul %5, %6, %cst_9 {dimension_numbers = #tpu.dot_dimension_numbers<[1], [0], [0], [1], [0, 0, 1, 1], [], []>} : vector<16x32xf32>, vector<32x32xf32>, vector<16x32xf32> -> vector<16x32xf32>
    %c0_10 = arith.constant 0 : index
    %c0_11 = arith.constant 0 : index
    %c0_12 = arith.constant 0 : index
    %8 = vector.load %arg3[%c0_10, %c0_11, %c0_12] : memref<2x8x32xf32, #tpu.memory_space<vmem>>, vector<2x8x32xf32>
    %9 = vector.shape_cast %8 : vector<2x8x32xf32> to vector<16x32xf32>
    %c0_13 = arith.constant 0 : index
    %c0_14 = arith.constant 0 : index
    %10 = vector.load %arg6[%c0_13, %c0_14] : memref<32x32xf32, #tpu.memory_space<vmem>>, vector<32x32xf32>
    %cst_15 = arith.constant dense<0.000000e+00> : vector<16x32xf32>
    %11 = tpu.matmul %9, %10, %cst_15 {dimension_numbers = #tpu.dot_dimension_numbers<[1], [0], [0], [1], [0, 0, 1, 1], [], []>} : vector<16x32xf32>, vector<32x32xf32>, vector<16x32xf32> -> vector<16x32xf32>
    %12 = vector.extract_strided_slice %3 {offsets = [0, 0], sizes = [8, 32], strides = [1, 1]} : vector<16x32xf32> to vector<8x32xf32>
    %13 = vector.extract_strided_slice %7 {offsets = [0, 0], sizes = [8, 32], strides = [1, 1]} : vector<16x32xf32> to vector<8x32xf32>
    %14 = vector.extract_strided_slice %11 {offsets = [0, 0], sizes = [8, 32], strides = [1, 1]} : vector<16x32xf32> to vector<8x32xf32>
    %15 = vector.extract_strided_slice %12 {offsets = [0, 0], sizes = [8, 8], strides = [1, 1]} : vector<8x32xf32> to vector<8x8xf32>
    %16 = vector.extract_strided_slice %13 {offsets = [0, 0], sizes = [8, 8], strides = [1, 1]} : vector<8x32xf32> to vector<8x8xf32>
    %cst_16 = arith.constant dense<0.000000e+00> : vector<8x8xf32>
    %17 = tpu.matmul %15, %16, %cst_16 {dimension_numbers = #tpu.dot_dimension_numbers<[1], [1], [0], [0], [0, 0, 1, 0], [], []>} : vector<8x8xf32>, vector<8x8xf32>, vector<8x8xf32> -> vector<8x8xf32>
    %cst_17 = arith.constant dense<0xFF800000> : vector<8xf32>
    %18 = vector.multi_reduction <maximumf>, %17, %cst_17 [1] : vector<8x8xf32> to vector<8xf32>
    %19 = vector.shape_cast %18 : vector<8xf32> to vector<8x1xf32>
    %20 = vector.broadcast %19 : vector<8x1xf32> to vector<8x8xf32>
    %21 = arith.subf %17, %20 : vector<8x8xf32>
    %22 = math.exp %21 : vector<8x8xf32>
    %cst_18 = arith.constant dense<0.000000e+00> : vector<8xf32>
    %23 = vector.multi_reduction <add>, %22, %cst_18 [1] : vector<8x8xf32> to vector<8xf32>
    %24 = vector.shape_cast %23 : vector<8xf32> to vector<8x1xf32>
    %25 = tpu.reciprocal %24 {approx = true} : vector<8x1xf32> -> vector<8x1xf32>
    %26 = vector.broadcast %25 : vector<8x1xf32> to vector<8x8xf32>
    %27 = arith.mulf %22, %26 : vector<8x8xf32>
    %28 = vector.extract_strided_slice %14 {offsets = [0, 0], sizes = [8, 8], strides = [1, 1]} : vector<8x32xf32> to vector<8x8xf32>
    %cst_19 = arith.constant dense<0.000000e+00> : vector<8x8xf32>
    %29 = tpu.matmul %27, %28, %cst_19 {dimension_numbers = #tpu.dot_dimension_numbers<[1], [0], [0], [1], [0, 0, 1, 1], [], []>} : vector<8x8xf32>, vector<8x8xf32>, vector<8x8xf32> -> vector<8x8xf32>
    %30 = vector.extract_strided_slice %12 {offsets = [0, 8], sizes = [8, 8], strides = [1, 1]} : vector<8x32xf32> to vector<8x8xf32>
    %31 = vector.extract_strided_slice %13 {offsets = [0, 8], sizes = [8, 8], strides = [1, 1]} : vector<8x32xf32> to vector<8x8xf32>
    %cst_20 = arith.constant dense<0.000000e+00> : vector<8x8xf32>
    %32 = tpu.matmul %30, %31, %cst_20 {dimension_numbers = #tpu.dot_dimension_numbers<[1], [1], [0], [0], [0, 0, 1, 0], [], []>} : vector<8x8xf32>, vector<8x8xf32>, vector<8x8xf32> -> vector<8x8xf32>
    %cst_21 = arith.constant dense<0xFF800000> : vector<8xf32>
    %33 = vector.multi_reduction <maximumf>, %32, %cst_21 [1] : vector<8x8xf32> to vector<8xf32>
    %34 = vector.shape_cast %33 : vector<8xf32> to vector<8x1xf32>
    %35 = vector.broadcast %34 : vector<8x1xf32> to vector<8x8xf32>
    %36 = arith.subf %32, %35 : vector<8x8xf32>
    %37 = math.exp %36 : vector<8x8xf32>
    %cst_22 = arith.constant dense<0.000000e+00> : vector<8xf32>
    %38 = vector.multi_reduction <add>, %37, %cst_22 [1] : vector<8x8xf32> to vector<8xf32>
    %39 = vector.shape_cast %38 : vector<8xf32> to vector<8x1xf32>
    %40 = tpu.reciprocal %39 {approx = true} : vector<8x1xf32> -> vector<8x1xf32>
    %41 = vector.broadcast %40 : vector<8x1xf32> to vector<8x8xf32>
    %42 = arith.mulf %37, %41 : vector<8x8xf32>
    %43 = vector.extract_strided_slice %14 {offsets = [0, 8], sizes = [8, 8], strides = [1, 1]} : vector<8x32xf32> to vector<8x8xf32>
    %cst_23 = arith.constant dense<0.000000e+00> : vector<8x8xf32>
    %44 = tpu.matmul %42, %43, %cst_23 {dimension_numbers = #tpu.dot_dimension_numbers<[1], [0], [0], [1], [0, 0, 1, 1], [], []>} : vector<8x8xf32>, vector<8x8xf32>, vector<8x8xf32> -> vector<8x8xf32>
    %45 = vector.extract_strided_slice %12 {offsets = [0, 16], sizes = [8, 8], strides = [1, 1]} : vector<8x32xf32> to vector<8x8xf32>
    %46 = vector.extract_strided_slice %13 {offsets = [0, 16], sizes = [8, 8], strides = [1, 1]} : vector<8x32xf32> to vector<8x8xf32>
    %cst_24 = arith.constant dense<0.000000e+00> : vector<8x8xf32>
    %47 = tpu.matmul %45, %46, %cst_24 {dimension_numbers = #tpu.dot_dimension_numbers<[1], [1], [0], [0], [0, 0, 1, 0], [], []>} : vector<8x8xf32>, vector<8x8xf32>, vector<8x8xf32> -> vector<8x8xf32>
    %cst_25 = arith.constant dense<0xFF800000> : vector<8xf32>
    %48 = vector.multi_reduction <maximumf>, %47, %cst_25 [1] : vector<8x8xf32> to vector<8xf32>
    %49 = vector.shape_cast %48 : vector<8xf32> to vector<8x1xf32>
    %50 = vector.broadcast %49 : vector<8x1xf32> to vector<8x8xf32>
    %51 = arith.subf %47, %50 : vector<8x8xf32>
    %52 = math.exp %51 : vector<8x8xf32>
    %cst_26 = arith.constant dense<0.000000e+00> : vector<8xf32>
    %53 = vector.multi_reduction <add>, %52, %cst_26 [1] : vector<8x8xf32> to vector<8xf32>
    %54 = vector.shape_cast %53 : vector<8xf32> to vector<8x1xf32>
    %55 = tpu.reciprocal %54 {approx = true} : vector<8x1xf32> -> vector<8x1xf32>
    %56 = vector.broadcast %55 : vector<8x1xf32> to vector<8x8xf32>
    %57 = arith.mulf %52, %56 : vector<8x8xf32>
    %58 = vector.extract_strided_slice %14 {offsets = [0, 16], sizes = [8, 8], strides = [1, 1]} : vector<8x32xf32> to vector<8x8xf32>
    %cst_27 = arith.constant dense<0.000000e+00> : vector<8x8xf32>
    %59 = tpu.matmul %57, %58, %cst_27 {dimension_numbers = #tpu.dot_dimension_numbers<[1], [0], [0], [1], [0, 0, 1, 1], [], []>} : vector<8x8xf32>, vector<8x8xf32>, vector<8x8xf32> -> vector<8x8xf32>
    %60 = vector.extract_strided_slice %12 {offsets = [0, 24], sizes = [8, 8], strides = [1, 1]} : vector<8x32xf32> to vector<8x8xf32>
    %61 = vector.extract_strided_slice %13 {offsets = [0, 24], sizes = [8, 8], strides = [1, 1]} : vector<8x32xf32> to vector<8x8xf32>
    %cst_28 = arith.constant dense<0.000000e+00> : vector<8x8xf32>
    %62 = tpu.matmul %60, %61, %cst_28 {dimension_numbers = #tpu.dot_dimension_numbers<[1], [1], [0], [0], [0, 0, 1, 0], [], []>} : vector<8x8xf32>, vector<8x8xf32>, vector<8x8xf32> -> vector<8x8xf32>
    %cst_29 = arith.constant dense<0xFF800000> : vector<8xf32>
    %63 = vector.multi_reduction <maximumf>, %62, %cst_29 [1] : vector<8x8xf32> to vector<8xf32>
    %64 = vector.shape_cast %63 : vector<8xf32> to vector<8x1xf32>
    %65 = vector.broadcast %64 : vector<8x1xf32> to vector<8x8xf32>
    %66 = arith.subf %62, %65 : vector<8x8xf32>
    %67 = math.exp %66 : vector<8x8xf32>
    %cst_30 = arith.constant dense<0.000000e+00> : vector<8xf32>
    %68 = vector.multi_reduction <add>, %67, %cst_30 [1] : vector<8x8xf32> to vector<8xf32>
    %69 = vector.shape_cast %68 : vector<8xf32> to vector<8x1xf32>
    %70 = tpu.reciprocal %69 {approx = true} : vector<8x1xf32> -> vector<8x1xf32>
    %71 = vector.broadcast %70 : vector<8x1xf32> to vector<8x8xf32>
    %72 = arith.mulf %67, %71 : vector<8x8xf32>
    %73 = vector.extract_strided_slice %14 {offsets = [0, 24], sizes = [8, 8], strides = [1, 1]} : vector<8x32xf32> to vector<8x8xf32>
    %cst_31 = arith.constant dense<0.000000e+00> : vector<8x8xf32>
    %74 = tpu.matmul %72, %73, %cst_31 {dimension_numbers = #tpu.dot_dimension_numbers<[1], [0], [0], [1], [0, 0, 1, 1], [], []>} : vector<8x8xf32>, vector<8x8xf32>, vector<8x8xf32> -> vector<8x8xf32>
    %75 = tpu.concatenate %29, %44, %59, %74 in 1 : vector<8x8xf32>, vector<8x8xf32>, vector<8x8xf32>, vector<8x8xf32> -> vector<8x32xf32>
    %76 = vector.extract_strided_slice %3 {offsets = [8, 0], sizes = [8, 32], strides = [1, 1]} : vector<16x32xf32> to vector<8x32xf32>
    %77 = vector.extract_strided_slice %7 {offsets = [8, 0], sizes = [8, 32], strides = [1, 1]} : vector<16x32xf32> to vector<8x32xf32>
    %78 = vector.extract_strided_slice %11 {offsets = [8, 0], sizes = [8, 32], strides = [1, 1]} : vector<16x32xf32> to vector<8x32xf32>
    %79 = vector.extract_strided_slice %76 {offsets = [0, 0], sizes = [8, 8], strides = [1, 1]} : vector<8x32xf32> to vector<8x8xf32>
    %80 = vector.extract_strided_slice %77 {offsets = [0, 0], sizes = [8, 8], strides = [1, 1]} : vector<8x32xf32> to vector<8x8xf32>
    %cst_32 = arith.constant dense<0.000000e+00> : vector<8x8xf32>
    %81 = tpu.matmul %79, %80, %cst_32 {dimension_numbers = #tpu.dot_dimension_numbers<[1], [1], [0], [0], [0, 0, 1, 0], [], []>} : vector<8x8xf32>, vector<8x8xf32>, vector<8x8xf32> -> vector<8x8xf32>
    %cst_33 = arith.constant dense<0xFF800000> : vector<8xf32>
    %82 = vector.multi_reduction <maximumf>, %81, %cst_33 [1] : vector<8x8xf32> to vector<8xf32>
    %83 = vector.shape_cast %82 : vector<8xf32> to vector<8x1xf32>
    %84 = vector.broadcast %83 : vector<8x1xf32> to vector<8x8xf32>
    %85 = arith.subf %81, %84 : vector<8x8xf32>
    %86 = math.exp %85 : vector<8x8xf32>
    %cst_34 = arith.constant dense<0.000000e+00> : vector<8xf32>
    %87 = vector.multi_reduction <add>, %86, %cst_34 [1] : vector<8x8xf32> to vector<8xf32>
    %88 = vector.shape_cast %87 : vector<8xf32> to vector<8x1xf32>
    %89 = tpu.reciprocal %88 {approx = true} : vector<8x1xf32> -> vector<8x1xf32>
    %90 = vector.broadcast %89 : vector<8x1xf32> to vector<8x8xf32>
    %91 = arith.mulf %86, %90 : vector<8x8xf32>
    %92 = vector.extract_strided_slice %78 {offsets = [0, 0], sizes = [8, 8], strides = [1, 1]} : vector<8x32xf32> to vector<8x8xf32>
    %cst_35 = arith.constant dense<0.000000e+00> : vector<8x8xf32>
    %93 = tpu.matmul %91, %92, %cst_35 {dimension_numbers = #tpu.dot_dimension_numbers<[1], [0], [0], [1], [0, 0, 1, 1], [], []>} : vector<8x8xf32>, vector<8x8xf32>, vector<8x8xf32> -> vector<8x8xf32>
    %94 = vector.extract_strided_slice %76 {offsets = [0, 8], sizes = [8, 8], strides = [1, 1]} : vector<8x32xf32> to vector<8x8xf32>
    %95 = vector.extract_strided_slice %77 {offsets = [0, 8], sizes = [8, 8], strides = [1, 1]} : vector<8x32xf32> to vector<8x8xf32>
    %cst_36 = arith.constant dense<0.000000e+00> : vector<8x8xf32>
    %96 = tpu.matmul %94, %95, %cst_36 {dimension_numbers = #tpu.dot_dimension_numbers<[1], [1], [0], [0], [0, 0, 1, 0], [], []>} : vector<8x8xf32>, vector<8x8xf32>, vector<8x8xf32> -> vector<8x8xf32>
    %cst_37 = arith.constant dense<0xFF800000> : vector<8xf32>
    %97 = vector.multi_reduction <maximumf>, %96, %cst_37 [1] : vector<8x8xf32> to vector<8xf32>
    %98 = vector.shape_cast %97 : vector<8xf32> to vector<8x1xf32>
    %99 = vector.broadcast %98 : vector<8x1xf32> to vector<8x8xf32>
    %100 = arith.subf %96, %99 : vector<8x8xf32>
    %101 = math.exp %100 : vector<8x8xf32>
    %cst_38 = arith.constant dense<0.000000e+00> : vector<8xf32>
    %102 = vector.multi_reduction <add>, %101, %cst_38 [1] : vector<8x8xf32> to vector<8xf32>
    %103 = vector.shape_cast %102 : vector<8xf32> to vector<8x1xf32>
    %104 = tpu.reciprocal %103 {approx = true} : vector<8x1xf32> -> vector<8x1xf32>
    %105 = vector.broadcast %104 : vector<8x1xf32> to vector<8x8xf32>
    %106 = arith.mulf %101, %105 : vector<8x8xf32>
    %107 = vector.extract_strided_slice %78 {offsets = [0, 8], sizes = [8, 8], strides = [1, 1]} : vector<8x32xf32> to vector<8x8xf32>
    %cst_39 = arith.constant dense<0.000000e+00> : vector<8x8xf32>
    %108 = tpu.matmul %106, %107, %cst_39 {dimension_numbers = #tpu.dot_dimension_numbers<[1], [0], [0], [1], [0, 0, 1, 1], [], []>} : vector<8x8xf32>, vector<8x8xf32>, vector<8x8xf32> -> vector<8x8xf32>
    %109 = vector.extract_strided_slice %76 {offsets = [0, 16], sizes = [8, 8], strides = [1, 1]} : vector<8x32xf32> to vector<8x8xf32>
    %110 = vector.extract_strided_slice %77 {offsets = [0, 16], sizes = [8, 8], strides = [1, 1]} : vector<8x32xf32> to vector<8x8xf32>
    %cst_40 = arith.constant dense<0.000000e+00> : vector<8x8xf32>
    %111 = tpu.matmul %109, %110, %cst_40 {dimension_numbers = #tpu.dot_dimension_numbers<[1], [1], [0], [0], [0, 0, 1, 0], [], []>} : vector<8x8xf32>, vector<8x8xf32>, vector<8x8xf32> -> vector<8x8xf32>
    %cst_41 = arith.constant dense<0xFF800000> : vector<8xf32>
    %112 = vector.multi_reduction <maximumf>, %111, %cst_41 [1] : vector<8x8xf32> to vector<8xf32>
    %113 = vector.shape_cast %112 : vector<8xf32> to vector<8x1xf32>
    %114 = vector.broadcast %113 : vector<8x1xf32> to vector<8x8xf32>
    %115 = arith.subf %111, %114 : vector<8x8xf32>
    %116 = math.exp %115 : vector<8x8xf32>
    %cst_42 = arith.constant dense<0.000000e+00> : vector<8xf32>
    %117 = vector.multi_reduction <add>, %116, %cst_42 [1] : vector<8x8xf32> to vector<8xf32>
    %118 = vector.shape_cast %117 : vector<8xf32> to vector<8x1xf32>
    %119 = tpu.reciprocal %118 {approx = true} : vector<8x1xf32> -> vector<8x1xf32>
    %120 = vector.broadcast %119 : vector<8x1xf32> to vector<8x8xf32>
    %121 = arith.mulf %116, %120 : vector<8x8xf32>
    %122 = vector.extract_strided_slice %78 {offsets = [0, 16], sizes = [8, 8], strides = [1, 1]} : vector<8x32xf32> to vector<8x8xf32>
    %cst_43 = arith.constant dense<0.000000e+00> : vector<8x8xf32>
    %123 = tpu.matmul %121, %122, %cst_43 {dimension_numbers = #tpu.dot_dimension_numbers<[1], [0], [0], [1], [0, 0, 1, 1], [], []>} : vector<8x8xf32>, vector<8x8xf32>, vector<8x8xf32> -> vector<8x8xf32>
    %124 = vector.extract_strided_slice %76 {offsets = [0, 24], sizes = [8, 8], strides = [1, 1]} : vector<8x32xf32> to vector<8x8xf32>
    %125 = vector.extract_strided_slice %77 {offsets = [0, 24], sizes = [8, 8], strides = [1, 1]} : vector<8x32xf32> to vector<8x8xf32>
    %cst_44 = arith.constant dense<0.000000e+00> : vector<8x8xf32>
    %126 = tpu.matmul %124, %125, %cst_44 {dimension_numbers = #tpu.dot_dimension_numbers<[1], [1], [0], [0], [0, 0, 1, 0], [], []>} : vector<8x8xf32>, vector<8x8xf32>, vector<8x8xf32> -> vector<8x8xf32>
    %cst_45 = arith.constant dense<0xFF800000> : vector<8xf32>
    %127 = vector.multi_reduction <maximumf>, %126, %cst_45 [1] : vector<8x8xf32> to vector<8xf32>
    %128 = vector.shape_cast %127 : vector<8xf32> to vector<8x1xf32>
    %129 = vector.broadcast %128 : vector<8x1xf32> to vector<8x8xf32>
    %130 = arith.subf %126, %129 : vector<8x8xf32>
    %131 = math.exp %130 : vector<8x8xf32>
    %cst_46 = arith.constant dense<0.000000e+00> : vector<8xf32>
    %132 = vector.multi_reduction <add>, %131, %cst_46 [1] : vector<8x8xf32> to vector<8xf32>
    %133 = vector.shape_cast %132 : vector<8xf32> to vector<8x1xf32>
    %134 = tpu.reciprocal %133 {approx = true} : vector<8x1xf32> -> vector<8x1xf32>
    %135 = vector.broadcast %134 : vector<8x1xf32> to vector<8x8xf32>
    %136 = arith.mulf %131, %135 : vector<8x8xf32>
    %137 = vector.extract_strided_slice %78 {offsets = [0, 24], sizes = [8, 8], strides = [1, 1]} : vector<8x32xf32> to vector<8x8xf32>
    %cst_47 = arith.constant dense<0.000000e+00> : vector<8x8xf32>
    %138 = tpu.matmul %136, %137, %cst_47 {dimension_numbers = #tpu.dot_dimension_numbers<[1], [0], [0], [1], [0, 0, 1, 1], [], []>} : vector<8x8xf32>, vector<8x8xf32>, vector<8x8xf32> -> vector<8x8xf32>
    %139 = tpu.concatenate %93, %108, %123, %138 in 1 : vector<8x8xf32>, vector<8x8xf32>, vector<8x8xf32>, vector<8x8xf32> -> vector<8x32xf32>
    %140 = tpu.concatenate %75, %139 in 0 : vector<8x32xf32>, vector<8x32xf32> -> vector<16x32xf32>
    %c0_48 = arith.constant 0 : index
    %c0_49 = arith.constant 0 : index
    %141 = vector.load %arg7[%c0_48, %c0_49] : memref<32x32xf32, #tpu.memory_space<vmem>>, vector<32x32xf32>
    %cst_50 = arith.constant dense<0.000000e+00> : vector<16x32xf32>
    %142 = tpu.matmul %140, %141, %cst_50 {dimension_numbers = #tpu.dot_dimension_numbers<[1], [0], [0], [1], [0, 0, 1, 1], [], []>} : vector<16x32xf32>, vector<32x32xf32>, vector<16x32xf32> -> vector<16x32xf32>
    %c0_51 = arith.constant 0 : index
    %c0_52 = arith.constant 0 : index
    %143 = vector.load %arg8[%c0_51, %c0_52] : memref<1x32xf32, #tpu.memory_space<vmem>>, vector<1x32xf32>
    %144 = vector.broadcast %143 : vector<1x32xf32> to vector<16x32xf32>
    %145 = arith.addf %142, %144 : vector<16x32xf32>
    %146 = vector.shape_cast %145 : vector<16x32xf32> to vector<2x8x32xf32>
    %c0_53 = arith.constant 0 : index
    %c0_54 = arith.constant 0 : index
    %c0_55 = arith.constant 0 : index
    %147 = vector.load %arg9[%c0_53, %c0_54, %c0_55] : memref<2x8x32xf32, #tpu.memory_space<vmem>>, vector<2x8x32xf32>
    tpu.vector_store %arg9[%c0_53, %c0_54, %c0_55], %146 {strides = array<i32>} : memref<2x8x32xf32, #tpu.memory_space<vmem>>, vector<2x8x32xf32>,
    return
  }
  func.func @transform_0(%arg0: i32) -> (i32, i32, i32) {
    %c0_i32 = arith.constant 0 : i32
    %c0_i32_0 = arith.constant 0 : i32
    %c0_i32_1 = arith.constant 0 : i32
    return %arg0, %c0_i32, %c0_i32_0 : i32, i32, i32
  }
  func.func @transform_1(%arg0: i32) -> (i32, i32, i32) {
    %c0_i32 = arith.constant 0 : i32
    %c0_i32_0 = arith.constant 0 : i32
    %c0_i32_1 = arith.constant 0 : i32
    return %arg0, %c0_i32, %c0_i32_0 : i32, i32, i32
  }
  func.func @transform_2(%arg0: i32) -> (i32, i32, i32) {
    %c0_i32 = arith.constant 0 : i32
    %c0_i32_0 = arith.constant 0 : i32
    %c0_i32_1 = arith.constant 0 : i32
    return %arg0, %c0_i32, %c0_i32_0 : i32, i32, i32
  }
  func.func @transform_3(%arg0: i32) -> (i32, i32) {
    %c0_i32 = arith.constant 0 : i32
    %c0_i32_0 = arith.constant 0 : i32
    %c0_i32_1 = arith.constant 0 : i32
    return %c0_i32, %c0_i32_0 : i32, i32
  }
  func.func @transform_4(%arg0: i32) -> (i32, i32) {
    %c0_i32 = arith.constant 0 : i32
    %c0_i32_0 = arith.constant 0 : i32
    %c0_i32_1 = arith.constant 0 : i32
    return %c0_i32, %c0_i32_0 : i32, i32
  }
  func.func @transform_5(%arg0: i32) -> (i32, i32) {
    %c0_i32 = arith.constant 0 : i32
    %c0_i32_0 = arith.constant 0 : i32
    %c0_i32_1 = arith.constant 0 : i32
    return %c0_i32, %c0_i32_0 : i32, i32
  }
  func.func @transform_6(%arg0: i32) -> (i32, i32) {
    %c0_i32 = arith.constant 0 : i32
    %c0_i32_0 = arith.constant 0 : i32
    %c0_i32_1 = arith.constant 0 : i32
    return %c0_i32, %c0_i32_0 : i32, i32
  }
  func.func @transform_7(%arg0: i32) -> (i32, i32) {
    %c0_i32 = arith.constant 0 : i32
    %c0_i32_0 = arith.constant 0 : i32
    %c0_i32_1 = arith.constant 0 : i32
    return %c0_i32, %c0_i32_0 : i32, i32
  }
  func.func @transform_8(%arg0: i32) -> (i32, i32, i32) {
    %c0_i32 = arith.constant 0 : i32
    %c0_i32_0 = arith.constant 0 : i32
    %c0_i32_1 = arith.constant 0 : i32
    return %arg0, %c0_i32, %c0_i32_0 : i32, i32, i32
  }
}

</mosaic_0001>

<bundles_post_ra>
// kernel: tpu_custom_call.1
= control target key start
LH: loop header
LB: loop body
LE: loop exit
PB: predicated region body
PF: predicated region fallthrough
CT: control target
= control target key end

     0   :  { %s3670_s0 = inlined_call_operand.hbm [shape: f32[4,8,32], index: 0, kind: input, shape index: {}]   ;;  %s3671_s1 = inlined_call_operand.hbm [shape: f32[4,8,32], index: 1, kind: input, shape index: {}]   ;;  %s3672_s2 = inlined_call_operand.hbm [shape: f32[4,8,32], index: 2, kind: input, shape index: {}]   ;;  %s3673_s3 = inlined_call_operand.hbm [shape: f32[32,32], index: 3, kind: input, shape index: {}]   ;;  %s3674_s4 = inlined_call_operand.hbm [shape: f32[32,32], index: 4, kind: input, shape index: {}]   ;;  %s3675_s5 = inlined_call_operand.hbm [shape: f32[32,32], index: 5, kind: input, shape index: {}]   ;;  %s3676_s6 = inlined_call_operand.hbm [shape: f32[32,32], index: 6, kind: input, shape index: {}]   ;;  %s3677_s7 = inlined_call_operand.vmem [shape: f32[1,32], index: 7, kind: input, shape index: {}]   ;;  %s3678_s8 = inlined_call_operand.hbm [shape: f32[4,8,32], index: 8, kind: output, shape index: {}]  }
   0x1   :  { %3704 = sst [smem:[#allocation26_spill]] %s3671_s1 }
   0x2   :  { %3705 = sst [smem:[#allocation27_spill]] %s3673_s3 }
   0x3   :  { %3706 = sst [smem:[#allocation28_spill]] %s3675_s5 }
   0x4   :  { %3707 = sst [smem:[#allocation29_spill]] %s3678_s8 }
   0x5   :  { %13 = vsyncpa [#allocation3], 0 }
   0x6   :  { %15 = vsyncpa [#allocation3 + $0x1], 0 }
   0x7   :  { %16 = vsyncpa [#allocation6], 0 }
   0x8   :  { %18 = vsyncpa [#allocation6 + $0x1], 0 }
   0x9   :  { %19 = vsyncpa [#allocation9], 0 }
   0xa   :  { %20 = vsyncpa [#allocation12], 0 }
   0xb   :  { %21 = vsyncpa [#allocation4], 0 }
   0xc   :  { %23 = vsyncpa [#allocation4 + $0x1], 0  ;;  %s3097_s27 = smov 0   ;;  %s3099_s28 = smov 0  }
   0xd   :  { %s3101_s29 = smov 0   ;;  %s3103_s30 = smov 0  }
   0xe LB: > { %3708 = sst [smem:[#allocation20_spill]] %s3019_s27  ;;  %s3118_s9 = sadd.s32 4294967295, %s3031_s30   ;;  %s3031_s30 = sphi %s3103_s30, %s3748_s30   ;;  %s3027_s29 = sphi %s3101_s29, %s3752_s29   ;;  %s3023_s28 = sphi %s3099_s28, %s3751_s28   ;;  %s3019_s27 = sphi %s3097_s27, %s3750_s27  }
   0xf   : > { %3709 = sst [smem:[#allocation21_spill]] %s3031_s30  ;;  %s2332_s10 = sadd.s32 4294967294, %s3031_s30  }
  0x10   : > { %p49_p0 = scmp.ne.s32.totalorder %s3023_s28, %s3019_s27  ;;  %p3679_p1 = scmp.eq.s32.totalorder %s3118_s9, 0 }
  0x11   : > { %p236_p3 = scmp.eq.s32.totalorder %s2332_s10, 1  ;;  %p2333_p5 = scmp.ge.s32.totalorder %s3031_s30, 1 }
  0x12   : > { %p3127_p4 = por %p3679_p1, %p49_p0  ;;  %p243_p7 = scmp.lt.s32.totalorder %s3031_s30, 3 }
  0x13   : > { %p3132_p6 = por %p236_p3, %p49_p0  ;;  %s3033_s14 = smov [#allocation8]  }
  0x14   : > { %s3710_s11 = scalar_select %p3127_p4, 1, 0 }
  0x15   : > { %s3711_s12 = scalar_select %p3132_p6, 1, 0 }
  0x16   : > { %p3137_p8 = pnand %p2333_p5, %p243_p7  ;;  %s255_s15 = sshll.u32 %s3033_s14, 4  ;;  %s3141_s15 = int_to_ptr.vmem [resolvable:$true] %s255_s15 }
  0x17   : > { %3712 = sst [smem:[#allocation22_spill]] %s3711_s12  ;;  %s3034_s17 = smov [#allocation11]  }
  0x18   : > { %s3713_s13 = scalar_select %p3137_p8, 1, 0 }
  0x19   : > { %p2635_p9 = pneg %p3137_p8  ;;  %s281_s18 = sshll.u32 %s3034_s17, 4  ;;  %s3152_s18 = int_to_ptr.vmem [resolvable:$true] %s281_s18 }
  0x1a   : > { %s3715_s3 = sld [smem:[#allocation27_spill]] }
  0x1b   : > { %p3148_p11 = pnand %p2635_p9, %p3679_p1 }
  0x1d   : > { %s3714_s16 = scalar_select %p3148_p11, 1, 0 }
  0x1e   : > { %p3162_p13 = pneg %p3148_p11 }
  0x20   : > { %s2751_s21 = scalar_lea.hbm %s3715_s3, 512 }
  0x21   : > { %p2752_p12 = scmp.ne.s32.totalorder %s3715_s3, %s2751_s21  ;;  %p2758_p5 = scmp.lt.u32.totalorder %s2751_s21, %s3715_s3 }
  0x22   : > { %s3716_s24 = scalar_select %p3162_p13, 1, 0 }
  0x23   : > { %p2754_p0 = pnand %p3162_p13, %p2752_p12 }
  0x25   : > { %p2755_p3 = pneg %p2754_p0 }
  0x27   : > { %p2760_p7 = pnand %p2758_p5, %p2755_p3 }
  0x29   : > { %2763 = shalt.err (!%p2760_p7)
}
  0x2a   : > { %s2764_s10 = scalar_lea.vmem %s3141_s15, 512  ;;  %p2772_p2 = scmp.lt.s32.totalorder %s3141_s15, %s3141_s15 }
  0x2b   : > { %p2765_p9 = scmp.ne.s32.totalorder %s3141_s15, %s2764_s10  ;;  %p2773_p6 = scmp.lt.s32.totalorder %s2764_s10, %s2764_s10 }
  0x2d   : > { %p2767_p10 = pnand %p2765_p9, %p3162_p13  ;;  %p2774_p12 = por %p2773_p6, %p2772_p2 }
  0x2f   : > { %p2768_p1 = pneg %p2767_p10 }
  0x31   : > { %p2775_p0 = pnand %p2774_p12, %p2768_p1 }
  0x33   : > { %2778 = shalt.err (!%p2775_p0)
}
  0x34   : > { %s3682_s14 = smov 128   ;;  %s3684_s17 = smov 8  }
  0x35   : > { %2638 = dma.hbm_to_vmem [thread:$0]  (!%p3148_p11), %s3715_s3, 512, %s3141_s15, [#allocation9], %s3682_s14, %s3682_s14, %s3684_s17  }
  0x36   : > { %s3717_s5 = sld [smem:[#allocation28_spill]] }
  0x3c   : > { %s2779_s23 = scalar_lea.hbm %s3717_s5, 512 }
  0x3d   : > { %p2780_p1 = scmp.ne.s32.totalorder %s3717_s5, %s2779_s23  ;;  %p2786_p10 = scmp.lt.u32.totalorder %s2779_s23, %s3717_s5 }
  0x3f   : > { %p2782_p2 = pnand %p2780_p1, %p3162_p13 }
  0x41   : > { %p2783_p6 = pneg %p2782_p2 }
  0x43   : > { %p2788_p3 = pnand %p2786_p10, %p2783_p6 }
  0x45   : > { %2791 = shalt.err (!%p2788_p3)
}
  0x46   : > { %s2792_s15 = scalar_lea.vmem %s3152_s18, 512  ;;  %p2800_p12 = scmp.lt.s32.totalorder %s3152_s18, %s3152_s18 }
  0x47   : > { %p2793_p5 = scmp.ne.s32.totalorder %s3152_s18, %s2792_s15  ;;  %p2801_p0 = scmp.lt.s32.totalorder %s2792_s15, %s2792_s15 }
  0x49   : > { %p2795_p7 = pnand %p2793_p5, %p3162_p13  ;;  %p2802_p1 = por %p2801_p0, %p2800_p12 }
  0x4b   : > { %p2796_p9 = pneg %p2795_p7 }
  0x4d   : > { %p2803_p2 = pnand %p2802_p1, %p2796_p9 }
  0x4f   : > { %2806 = shalt.err (!%p2803_p2)
}
  0x50   : > { %2644 = dma.hbm_to_vmem [thread:$0]  (!%p3148_p11), %s3717_s5, 512, %s3152_s18, [#allocation12], %s3682_s14, %s3682_s14, %s3684_s17  }
  0x51   : > { %s3213_s20 = sadd.s32 1, %s3031_s30   ;;  %s36_s21 = sadd.s32 1, %s3027_s29 }
  0x52   : > { %3718 = sst [smem:[#allocation23_spill]] %s3213_s20  ;;  %s33_s22 = ssub.s32 %s3031_s30, %s3213_s20 }
  0x53   : > { %p43_p6 = scmp.ne.s32.totalorder %s3027_s29, %s3023_s28  ;;  %p34_p10 = scmp.eq.s32.totalorder %s33_s22, 0 }
  0x54   : > { %p44_p3 = scmp.eq.s32.totalorder %s3031_s30, 0  ;;  %p3719_p5 = scmp.eq.s32.totalorder %s3118_s9, 1 }
  0x55   : > { %p2666_p9 = scmp.lt.s32.totalorder %s3031_s30, 2  ;;  %s3681_s26 = sand.u32 1, %s3027_s29  }
  0x56   : > { %p3223_p7 = por %p3719_p5, %p43_p6  ;;  %p45_p12 = por %p44_p3, %p43_p6 }
  0x57   : > { %s3229_s25 = scalar_select %p34_p10, %s3027_s29, %s36_s21  }
  0x58   : > { %s3720_s23 = scalar_select %p3223_p7, 1, 0 }
  0x59   : > { %3722 = sst [smem:[#allocation25_spill]] %s3229_s25  ;;  %s3234_s18 = sshll.u32 %s3681_s26, 4 }
  0x5a   : > { %3721 = sst [smem:[#allocation24_spill]] %s3720_s23  ;;  %s3237_s10 = sshll.u32 %s3031_s30, 8 }
  0x5b   : > { %p3239_p0 = pnand %p2666_p9, %p45_p12  ;;  %s332_s12 = sand.u32 1, %s3031_s30  }
  0x5c   : > { %s3724_s1 = sld [smem:[#allocation26_spill]]  ;;  %s336_s26 = scalar_lea.vmem [#allocation5], %s3234_s18 }
  0x5d   : > { %s3723_s15 = scalar_select %p3239_p0, 1, 0 }
  0x5e   : > { %s343_s14 = sshll.u32 %s336_s26, 4  ;;  %s3037_s17 = smov [#allocation10]   ;;  %s3251_s14 = int_to_ptr.vmem [resolvable:$true] %s343_s14 }
  0x5f   : > { %s3253_s3 = sshll.u32 %s3037_s17, 4  ;;  %s3255_s5 = scalar_lea.sflag [#allocation6], %s332_s12  ;;  %s269_s3 = int_to_ptr.vmem [resolvable:$true] %s3253_s3 }
  0x60   : > { %p3261_p2 = pneg %p3239_p0 }
  0x62   : > { %s3248_s21 = scalar_lea.hbm %s3724_s1, %s3237_s10  ;;  %s2812_s20 = scalar_lea.hbm %s3724_s1, 512 }
  0x63   : > { %s2807_s25 = scalar_lea.hbm %s3248_s21, 256  ;;  %p2813_p3 = scmp.lt.u32.totalorder %s3248_s21, %s3724_s1 }
  0x64   : > { %p2808_p1 = scmp.ne.s32.totalorder %s3248_s21, %s2807_s25  ;;  %p2814_p5 = scmp.lt.u32.totalorder %s2812_s20, %s2807_s25 }
  0x65   : > { %s3725_s19 = scalar_select %p3261_p2, 1, 0 }
  0x66   : > { %p2810_p6 = pnand %p3261_p2, %p2808_p1  ;;  %p2815_p9 = por %p2814_p5, %p2813_p3 }
  0x67   : > { %p2816_p12 = scmp.lt.u32.totalorder %s2807_s25, %s3248_s21 }
  0x68   : > { %p2811_p10 = pneg %p2810_p6 }
  0x69   : > { %p2817_p7 = por %p2816_p12, %p2815_p9 }
  0x6b   : > { %p2818_p4 = pnand %p2817_p7, %p2811_p10 }
  0x6d   : > { %2821 = shalt.err (!%p2818_p4)
}
  0x6e   : > { %s2822_s12 = scalar_lea.vmem %s3251_s14, 256  ;;  %s3038_s22 = smov [#allocation5]  }
  0x6f   : > { %p2823_p1 = scmp.ne.s32.totalorder %s3251_s14, %s2822_s12  ;;  %s2827_s26 = sshll.u32 %s3038_s22, 4  ;;  %s2828_s26 = int_to_ptr.vmem [resolvable:$false] %s2827_s26 }
  0x70   : > { %s2829_s30 = scalar_lea.vmem %s2828_s26, 512  ;;  %p2830_p11 = scmp.lt.s32.totalorder %s3251_s14, %s2828_s26 }
  0x71   : > { %p2825_p6 = pnand %p2823_p1, %p3261_p2  ;;  %p2831_p13 = scmp.lt.s32.totalorder %s2829_s30, %s2822_s12 }
  0x73   : > { %p2826_p8 = pneg %p2825_p6  ;;  %p2832_p3 = por %p2831_p13, %p2830_p11 }
  0x75   : > { %p2833_p5 = pnand %p2832_p3, %p2826_p8 }
  0x77   : > { %2836 = shalt.err (!%p2833_p5)
}
  0x78   : > { %s3726_s20 = smov 8   ;;  %s3727_s25 = smov 128  }
  0x79   : > { %2654 = dma.hbm_to_vmem [thread:$0]  (!%p3239_p0), %s3248_s21, 256, %s3251_s14, %s3255_s5, %s3727_s25, %s3727_s25, %s3726_s20  }
  0x7a   : > { %s2837_s26 = scalar_lea.hbm %s3674_s4, 512  ;;  %p3728_p8 = scmp.ne.s32.totalorder %s3716_s24, 0 }
  0x7b   : > { %p2838_p4 = scmp.ne.s32.totalorder %s3674_s4, %s2837_s26  ;;  %p2844_p7 = scmp.lt.u32.totalorder %s2837_s26, %s3674_s4 }
  0x7d   : > { %p2840_p11 = pnand %p2838_p4, %p3728_p8 }
  0x7f   : > { %p2841_p13 = pneg %p2840_p11 }
  0x81   : > { %p2846_p10 = pnand %p2844_p7, %p2841_p13 }
  0x83   : > { %2849 = shalt.err (!%p2846_p10)
}
  0x84   : > { %s2850_s8 = scalar_lea.vmem %s269_s3, 512  ;;  %p2858_p6 = scmp.lt.s32.totalorder %s269_s3, %s269_s3 }
  0x85   : > { %p2851_p9 = scmp.ne.s32.totalorder %s269_s3, %s2850_s8  ;;  %p2859_p3 = scmp.lt.s32.totalorder %s2850_s8, %s2850_s8 }
  0x87   : > { %p2853_p12 = pnand %p2851_p9, %p3728_p8  ;;  %p2860_p5 = por %p2859_p3, %p2858_p6 }
  0x89   : > { %p2854_p1 = pneg %p2853_p12 }
  0x8b   : > { %p2861_p0 = pnand %p2860_p5, %p2854_p1 }
  0x8d   : > { %2864 = shalt.err (!%p2861_p0)
}
  0x8e   : > { %p3729_p4 = scmp.ne.s32.totalorder %s3714_s16, 0  ;;  %s3039_s14 = smov [#allocation13]  }
  0x8f   : > { %s294_s21 = sshll.u32 %s3039_s14, 4  ;;  %s2865_s8 = scalar_lea.hbm %s3676_s6, 512  ;;  %s295_s21 = int_to_ptr.vmem [resolvable:$true] %s294_s21 }
  0x90   : > { %2641 = dma.hbm_to_vmem [thread:$0]  (!%p3729_p4), %s3674_s4, 512, %s269_s3, [#allocation9], %s3727_s25, %s3727_s25, %s3726_s20  }
  0x91   : > { %p2866_p0 = scmp.ne.s32.totalorder %s3676_s6, %s2865_s8  ;;  %p2872_p7 = scmp.lt.u32.totalorder %s2865_s8, %s3676_s6 }
  0x93   : > { %p2868_p11 = pnand %p2866_p0, %p3728_p8 }
  0x95   : > { %p2869_p13 = pneg %p2868_p11 }
  0x97   : > { %p2874_p10 = pnand %p2872_p7, %p2869_p13 }
  0x99   : > { %2877 = shalt.err (!%p2874_p10)
}
  0x9a   : > { %s2878_s3 = scalar_lea.vmem %s295_s21, 512  ;;  %p2886_p6 = scmp.lt.s32.totalorder %s295_s21, %s295_s21 }
  0x9b   : > { %p2879_p9 = scmp.ne.s32.totalorder %s295_s21, %s2878_s3  ;;  %p2887_p3 = scmp.lt.s32.totalorder %s2878_s3, %s2878_s3 }
  0x9d   : > { %p2881_p12 = pnand %p2879_p9, %p3728_p8  ;;  %p2888_p5 = por %p2887_p3, %p2886_p6 }
  0x9f   : > { %p2882_p1 = pneg %p2881_p12 }
  0xa1   : > { %p2889_p2 = pnand %p2888_p5, %p2882_p1 }
  0xa3   : > { %2892 = shalt.err (!%p2889_p2)
}
  0xa4   : > { %2647 = dma.hbm_to_vmem [thread:$0]  (!%p3729_p4), %s3676_s6, 512, %s295_s21, [#allocation12], %s3727_s25, %s3727_s25, %s3726_s20  }
  0xa5   : > { %s3335_s14 = scalar_lea.hbm %s3670_s0, %s3237_s10  ;;  %s315_s16 = scalar_lea.vmem [#allocation2], %s3234_s18 }
  0xa6   : > { %s322_s17 = sshll.u32 %s315_s16, 4  ;;  %s3730_s22 = sand.u32 1, %s3027_s29   ;;  %s3338_s17 = int_to_ptr.vmem [resolvable:$true] %s322_s17 }
  0xa7   : > { %s3342_s8 = scalar_lea.sflag [#allocation3], %s3730_s22  ;;  %s2893_s26 = scalar_lea.hbm %s3335_s14, 256 }
  0xa8   : > { %p2894_p2 = scmp.ne.s32.totalorder %s3335_s14, %s2893_s26  ;;  %p3731_p8 = scmp.ne.s32.totalorder %s3725_s19, 0 }
  0xa9   : > { %s2898_s30 = scalar_lea.hbm %s3670_s0, 512  ;;  %p2899_p11 = scmp.lt.u32.totalorder %s3335_s14, %s3670_s0 }
  0xaa   : > { %p2896_p4 = pnand %p2894_p2, %p3731_p8  ;;  %p2900_p13 = scmp.lt.u32.totalorder %s2898_s30, %s2893_s26 }
  0xab   : > { %p2902_p10 = scmp.lt.u32.totalorder %s2893_s26, %s3335_s14 }
  0xac   : > { %p2897_p0 = pneg %p2896_p4  ;;  %p2901_p7 = por %p2900_p13, %p2899_p11 }
  0xae   : > { %p2903_p9 = por %p2902_p10, %p2901_p7 }
  0xb0   : > { %p2904_p12 = pnand %p2903_p9, %p2897_p0 }
  0xb2   : > { %2907 = shalt.err (!%p2904_p12)
}
  0xb3   : > { %s2908_s1 = scalar_lea.vmem %s3338_s17, 256  ;;  %s3040_s24 = smov [#allocation2]  }
  0xb4   : > { %p2909_p1 = scmp.ne.s32.totalorder %s3338_s17, %s2908_s1  ;;  %s2913_s27 = sshll.u32 %s3040_s24, 4  ;;  %s2914_s27 = int_to_ptr.vmem [resolvable:$false] %s2913_s27 }
  0xb5   : > { %s2915_s16 = scalar_lea.vmem %s2914_s27, 512  ;;  %p2916_p5 = scmp.lt.s32.totalorder %s3338_s17, %s2914_s27 }
  0xb6   : > { %p2911_p6 = pnand %p2909_p1, %p3731_p8  ;;  %p2917_p2 = scmp.lt.s32.totalorder %s2915_s16, %s2908_s1 }
  0xb8   : > { %p2912_p3 = pneg %p2911_p6  ;;  %p2918_p4 = por %p2917_p2, %p2916_p5 }
  0xba   : > { %p2919_p11 = pnand %p2918_p4, %p2912_p3 }
  0xbc   : > { %2922 = shalt.err (!%p2919_p11)
}
  0xbd   : > { %p3732_p0 = scmp.ne.s32.totalorder %s3723_s15, 0  ;;  %s3373_s21 = scalar_lea.hbm %s3672_s2, %s3237_s10 }
  0xbe   : > { %s357_s12 = scalar_lea.vmem [#allocation7], %s3234_s18  ;;  %s2923_s3 = scalar_lea.hbm %s3373_s21, 256 }
  0xbf   : > { %2651 = dma.hbm_to_vmem [thread:$0]  (!%p3732_p0), %s3335_s14, 256, %s3338_s17, %s3342_s8, %s3727_s25, %s3727_s25, %s3726_s20  }
  0xc0   : > { %s364_s30 = sshll.u32 %s357_s12, 4  ;;  %p2924_p13 = scmp.ne.s32.totalorder %s3373_s21, %s2923_s3  ;;  %s3376_s30 = int_to_ptr.vmem [resolvable:$true] %s364_s30 }
  0xc1   : > { %s2928_s17 = scalar_lea.hbm %s3672_s2, 512  ;;  %p2929_p9 = scmp.lt.u32.totalorder %s3373_s21, %s3672_s2 }
  0xc2   : > { %p2926_p7 = pnand %p2924_p13, %p3731_p8  ;;  %p2930_p12 = scmp.lt.u32.totalorder %s2928_s17, %s2923_s3 }
  0xc3   : > { %p2932_p6 = scmp.lt.u32.totalorder %s2923_s3, %s3373_s21 }
  0xc4   : > { %p2927_p10 = pneg %p2926_p7  ;;  %p2931_p1 = por %p2930_p12, %p2929_p9 }
  0xc6   : > { %p2933_p3 = por %p2932_p6, %p2931_p1 }
  0xc8   : > { %p2934_p5 = pnand %p2933_p3, %p2927_p10 }
  0xca   : > { %2937 = shalt.err (!%p2934_p5)
}
  0xcb   : > { %s2938_s18 = scalar_lea.vmem %s3376_s30, 256  ;;  %s3041_s1 = smov [#allocation7]  }
  0xcc   : > { %p2939_p2 = scmp.ne.s32.totalorder %s3376_s30, %s2938_s18  ;;  %s2943_s24 = sshll.u32 %s3041_s1, 4  ;;  %s2944_s24 = int_to_ptr.vmem [resolvable:$false] %s2943_s24 }
  0xcd   : > { %s2945_s27 = scalar_lea.vmem %s2944_s24, 512  ;;  %p2946_p13 = scmp.lt.s32.totalorder %s3376_s30, %s2944_s24 }
  0xce   : > { %p2941_p4 = pnand %p2939_p2, %p3731_p8  ;;  %p2947_p7 = scmp.lt.s32.totalorder %s2945_s27, %s2938_s18 }
  0xd0   : > { %p2942_p11 = pneg %p2941_p4  ;;  %p2948_p9 = por %p2947_p7, %p2946_p13 }
  0xd2   : > { %p2949_p12 = pnand %p2948_p9, %p2942_p11 }
  0xd4   : > { %2952 = shalt.err (!%p2949_p12)
}
  0xd5   : > { %2657 = dma.hbm_to_vmem [thread:$0]  (!%p3732_p0), %s3373_s21, 256, %s3376_s30, %s3255_s5, %s3727_s25, %s3727_s25, %s3726_s20  }
  0xd6   : > { %p3733_p8 = scmp.ne.s32.totalorder %s3713_s13, 0 }
  0xd7   : > { %s3406_s19 = sand.u32 (!%p3733_p8), 1, %s3023_s28   ;;  %p3734_p10 = scmp.ne.s32.totalorder (!%p3733_p8), %s3710_s11, 0 }
  0xd8   : > { %376 = sbr.rel (%p3733_p8) target bundleno = 2161 (0x871), region = 52  ;;  %s3409_s16 = sshll.u32 (!%p3733_p8), %s3406_s19, 4 }
  0xd9   : > { %s379_s15 = scalar_lea.sflag (!%p3733_p8), [#allocation3], %s3406_s19  ;;  %s382_s22 = scalar_lea.vmem (!%p3733_p8), [#allocation2], %s3409_s16 }
  0xdf   : > { %2998 = dma.done.wait (%p3734_p10), %s379_s15, 256  }
  0xe0   : > { %3000 = vsyncadd (%p3734_p10), %s379_s15, 4294967040  ;;  %s387_s5 = sand.u32 1, %s3118_s9   ;;  %s391_s20 = scalar_lea.vmem [#allocation5], %s3409_s16 }
  0xe1   : > { %s388_s13 = scalar_lea.sflag [#allocation6], %s387_s5 }
  0xe2   : > { %3002 = dma.done.wait (%p3734_p10), %s388_s13, 512  }
  0xe3   : > { %3004 = vsyncadd (%p3734_p10), %s388_s13, 4294966784  ;;  %s400_s25 = scalar_lea.vmem [#allocation7], %s3409_s16  ;;  %p3735_p0 = scmp.eq.s32.totalorder %s3118_s9, 0 }
  0xe5   : > { %3006 = dma.done.wait (%p3735_p0), [#allocation9], 1024   ;;  %p3736_p1 = pmov %p3735_p0 }
  0xe6   : > { %p3737_p6 = pmov %p3735_p0 }
  0xe7   : > { %3008 = vsyncadd (%p3736_p1), [#allocation9], 4294966272 }
  0xe8   : > { %3010 = dma.done.wait (%p3737_p6), [#allocation12], 1024   ;;  %p3738_p3 = pmov %p3735_p0 }
  0xe9   : > { %v553_v0 = vld [vmem:[#allocation10] sm:$0xff]  ;;  %v554_v1 = vld [vmem:[#allocation10 + $0x8] sm:$0xff]  ;;  %vm469_vm0 = vcmask 261120   ;;  %v555_v5 = vld [vmem:[#allocation10 + $0x10] sm:$0xff]  ;;  %v3042_v16 = vmov 0.0   ;;  %vm3043_vm1 = vmmov 0  }
  0xea   : > { %3012 = vsyncadd (%p3738_p3), [#allocation12], 4294966272  ;;  %v465_v2 = vld [vmem:[#allocation8] sm:$0xff]  ;;  %v2587_v3 = vpack.c.bf16 %v554_v1, %v553_v0  ;;  %v466_v4 = vld [vmem:[#allocation8 + $0x8] sm:$0xff]  ;;  %vm725_vm2 = vcmask 64512   ;;  %s3044_s11 = smov 120  }
  0xeb   : > { %v556_v6 = vld [vmem:[#allocation10 + $0x18] sm:$0xff]  ;;  %v2579_v7 = vpack.c.bf16 %v466_v4, %v465_v2  ;;  %v467_v9 = vld [vmem:[#allocation8 + $0x10] sm:$0xff]  ;;  %s3045_s26 = smov 112   ;;  %s3046_s21 = smov 104   ;;  %v640_v21 = vld [vmem:[#allocation11] sm:$0xff]  ;;  %vm1395_vm3 = vcmask 130048  }
  0xec   : > { %v2591_v8 = vpack.c.bf16 %v556_v6, %v555_v5  ;;  %v468_v10 = vld [vmem:[#allocation8 + $0x18] sm:$0xff]  ;;  %v551_v11 = vld [vmem:[%s391_s20] sm:$0xff]  ;;  %2588 = vmatprep.subr.bf16.mxu1 %v2587_v3  ;;  %v641_v22 = vld [vmem:[#allocation11 + $0x8] sm:$0xff]  ;;  %s3047_s12 = smov 8   ;;  %s3048_s30 = smov 16   ;;  %vm1397_vm4 = vcmask 195584  }
  0xed   : > { %v2583_v12 = vpack.c.bf16 %v468_v10, %v467_v9  ;;  %2474 = vmatprep.mubr.msk.f32.mxu1 %vm469_vm0, %v551_v11  ;;  %v463_v13 = vld [vmem:[%s382_s22] sm:$0xff]  ;;  %2590 = vmatpush3.bf16.msra.mxu1 %v2587_v3  ;;  %v552_v14 = vld [vmem:[%s391_s20 + $0x8] sm:$0xff]  ;;  %v2595_v24 = vpack.c.bf16 %v641_v22, %v640_v21  ;;  %s3049_s3 = smov 24   ;;  %s3739_s17 = sld [smem:[#allocation24_spill]] }
  0xee   : > { %2580 = vmatprep.subr.bf16.mxu0 %v2579_v7  ;;  %2592 = vmatprep.subr.bf16.mxu1 %v2591_v8  ;;  %v464_v15 = vld [vmem:[%s382_s22 + $0x8] sm:$0xff]  ;;  %v642_v23 = vld [vmem:[#allocation11 + $0x10] sm:$0xff]  ;;  %s458_s8 = scalar_lea.vmem [#allocation14], %s3409_s16  ;;  %s2398_s18 = sshll.u32 %s3118_s9, 8 }
  0xef   : > { %2582 = vmatpush3.bf16.msra.mxu0 %v2579_v7  ;;  %2463 = vmatprep.mubr.msk.f32.mxu0 %vm469_vm0, %v463_v13  ;;  %v643_v25 = vld [vmem:[#allocation11 + $0x18] sm:$0xff]  ;;  %v638_v26 = vld [vmem:[%s400_s25] sm:$0xff]  ;;  %s2178_s10 = sshll.u32 %s458_s8, 4  ;;  %s3740_s27 = sld [smem:[#allocation29_spill]]  ;;  %s3618_s10 = int_to_ptr.vmem [resolvable:$true] %s2178_s10 }
  0xf0   : > { %2584 = vmatprep.subr.bf16.mxu0 %v2583_v12  ;;  %v2599_v27 = vpack.c.bf16 %v643_v25, %v642_v23  ;;  %v639_v28 = vld [vmem:[%s400_s25 + $0x8] sm:$0xff]  ;;  %s2165_s16 = scalar_lea.sflag [#allocation4], %s3406_s19  ;;  %s2953_s9 = scalar_lea.vmem %s3618_s10, 256 }
  0xf1   : > { %2594 = vmatpush3.bf16.msra.mxu1 %v2591_v8  ;;  %p2954_p5 = scmp.ne.s32.totalorder %s3618_s10, %s2953_s9  ;;  %s3050_s5 = smov [#allocation14]  }
  0xf2   : > { %2488 = vmatprep.subr.mxu1 %v3042_v16  ;;  %s2957_s13 = sshll.u32 %s3050_s5, 4  ;;  %s2958_s13 = int_to_ptr.vmem [resolvable:$false] %s2957_s13 }
  0xf3   : > { %2586 = vmatpush3.bf16.msra.mxu0 %v2583_v12  ;;  %p3742_p2 = scmp.ne.s32.totalorder %s3739_s17, 0  ;;  %s2959_s20 = scalar_lea.vmem %s2958_s13, 512 }
  0xf4   : > { %2475 = vmatmul.mubr.msk.f32.vlgmr.msra.gmra.mrb[0].mxu1 %vm469_vm0, %v552_v14  ;;  %2596 = vmatprep.subr.bf16.mxu0 %v2595_v24  ;;  %p2960_p13 = scmp.lt.s32.totalorder %s3618_s10, %s2958_s13  ;;  %p2961_p7 = scmp.lt.s32.totalorder %s2959_s20, %s2953_s9 }
  0xf5   : > { %2490 = vmatprep.mubr.msk.f32.mxu1 %vm3043_vm1, %v3042_v16  ;;  %s3741_s15 = smov %s3740_s27  ;;  %s3623_s22 = scalar_lea.hbm %s3740_s27, %s2398_s18 }
  0xf6   : > { %2464 = vmatmul.mubr.msk.f32.vlgmr.msra.gmra.mrb[0].mxu0 %vm469_vm0, %v464_v15  ;;  %p2955_p4 = pnand %p2954_p5, %p3742_p2  ;;  %p2962_p9 = por %p2961_p7, %p2960_p13 }
  0xf7   : > { %2485 = vmatprep.mubr.msk.f32.mxu0 %vm469_vm0, %v638_v26  ;;  %2598 = vmatpush3.bf16.msra.mxu0 %v2595_v24 }
  0xf8   : > { %2600 = vmatprep.subr.bf16.mxu0 %v2599_v27  ;;  %p2956_p11 = pneg %p2955_p4 }
  0xfa   : > { %p2963_p12 = pnand %p2962_p9, %p2956_p11 }
  0xfb   : > { %2602 = vmatpush3.bf16.msra.mxu0 %v2599_v27 }
  0xfc   : > { %2508 = vmatprep.subr.mxu0 %v3042_v16 }
  0xfe   : > { %2486 = vmatmul.mubr.msk.f32.vlgmr.msra.gmra.mrb[2].mxu0 %vm469_vm0, %v639_v28 }
  0xff   : > { %2510 = vmatprep.mubr.msk.f32.mxu0 %vm3043_vm1, %v3042_v16 }
 0x1c7   : > { %v3447_v17 = vpop.f32.mrb[0].mxu1 }
 0x1c8   : > { %v629_v18 = vpop.f32.mrb[1].mxu1 }
 0x1c9   : > { %v3449_v19 = vpop.f32.mrb[0].mxu0  ;;  %888 = vrot.lane.b32.xlu1 %v629_v18, %s3044_s11  ;;  %2489 = vmatpush3.xpose.msk.msra.mxu1 %vm725_vm2, %v629_v18 }
 0x1ca   : > { %v542_v20 = vpop.f32.mrb[1].mxu0  ;;  %2493 = vmatprep.subr.mxu1 %v3042_v16 }
 0x1cc   : > { %2491 = vmatmul.mubr.msk.f32.vlgmr.msra.gmra.mrb[2].mxu1 %vm725_vm2, %v542_v20 }
 0x1cd   : > { %886 = vrot.lane.b32.xlu1 %v542_v20, %s3044_s11  ;;  %2495 = vmatprep.mubr.msk.f32.mxu1 %vm3043_vm1, %v3042_v16 }
 0x1d1   : > { %1052 = vrot.lane.b32.xlu1 %v542_v20, %s3045_s26  ;;  %v3480_v37 = vpop.f32.mrb[2].mxu0 }
 0x1d2   : > { %v3482_v38 = vpop.f32.mrb[3].mxu0 }
 0x1d3   : > { %2494 = vmatpush3.msra.mxu1 %v3482_v38 }
 0x1d4   : > { %2498 = vmatprep.subr.mxu1 %v3042_v16 }
 0x1d5   : > { %1219 = vrot.lane.b32.xlu1 %v629_v18, %s3046_s21 }
 0x1d9   : > { %1217 = vrot.lane.b32.xlu1 %v542_v20, %s3046_s21 }
 0x1dd   : > { %1561 = vrot.lane.b32.xlu1 %v3447_v17, %s3044_s11 }
 0x1e1   : > { %1559 = vrot.lane.b32.xlu1 %v3449_v19, %s3044_s11 }
 0x1e5   : > { %1727 = vrot.lane.b32.xlu1 %v3447_v17, %s3045_s26 }
 0x1e9   : > { %1892 = vrot.lane.b32.xlu1 %v3447_v17, %s3046_s21 }
 0x23b   : > { %v889_v39 = vpop.permute.xlu1 %888 }
 0x23f   : > { %v887_v40 = vpop.permute.xlu1 %886 }
 0x243   : > { %v1053_v41 = vpop.permute.xlu1 %1052 }
 0x247   : > { %v1220_v42 = vpop.permute.xlu1 %1219 }
 0x24b   : > { %v1218_v43 = vpop.permute.xlu1 %1217 }
 0x24f   : > { %v1562_v46 = vpop.permute.xlu1 %1561 }
 0x253   : > { %v1560_v48 = vpop.permute.xlu1 %1559 }
 0x257   : > { %v1728_v50 = vpop.permute.xlu1 %1727 }
 0x25b   : > { %v1893_v52 = vpop.permute.xlu1 %1892 }
 0x29f   : > { %v798_v29 = vpop.f32.mrb[2].mxu1 }
 0x2a0   : > { %v2492_v30 = vpop.f32.mrb[3].mxu1  ;;  %v802_v31 = vsel %vm725_vm2, %v798_v29, -inf }
 0x2a1   : > { %803 = vmax.xlane.f32.xlu0 %v802_v31 }
 0x32e   : > { %v804_v32 = vpop.xlane.xlu0 %803 }
 0x32f   : > { %v805_v33 = vsub.f32 %v798_v29, %v804_v32 }
 0x331   : > { %v806_v34 = vmul.f32 1.442695, %v805_v33 }
 0x333   : > { %2719 = vpow2.f32 %v806_v34 }
 0x33d   : > { %v2720_v35 = vpop.eup %2719 }
 0x33e   : > { %v808_v36 = vsel %vm725_vm2, %v2720_v35, 0.0 }
 0x33f   : > { %809 = vadd.xlane.f32.xlu0 %v808_v36 }
 0x355   : > { %1054 = vrot.lane.b32.xlu0 %v629_v18, %s3045_s26 }
 0x359   : > { %1725 = vrot.lane.b32.xlu0 %v3449_v19, %s3045_s26 }
 0x35d   : > { %1890 = vrot.lane.b32.xlu0 %v3449_v19, %s3046_s21 }
 0x3cc   : > { %v810_v44 = vpop.xlane.xlu0 %809 }
 0x3cd   : > { %2721 = vrcp.f32 %v810_v44 }
 0x3d0   : > { %v1055_v45 = vpop.permute.xlu0 %1054 }
 0x3d1   : > { %2509 = vmatpush3.xpose.msk.msra.mxu0 %vm725_vm2, %v1055_v45 }
 0x3d2   : > { %2518 = vmatprep.subr.mxu0 %v3042_v16 }
 0x3d4   : > { %2511 = vmatmul.mubr.msk.f32.vlgmr.msra.gmra.mrb[4].mxu0 %vm725_vm2, %v1053_v41  ;;  %v1726_v51 = vpop.permute.xlu0 %1725 }
 0x3d5   : > { %2519 = vmatpush3.xpose.msk.msra.mxu0 %vm725_vm2, %v1220_v42  ;;  %2520 = vmatprep.mubr.msk.f32.mxu0 %vm3043_vm1, %v3042_v16 }
 0x3d6   : > { %2528 = vmatprep.subr.mxu0 %v3042_v16 }
 0x3d7   : > { %v2722_v47 = vpop.eup %2721 }
 0x3d8   : > { %v812_v49 = vmul.f32 %v2722_v47, %v2720_v35  ;;  %2521 = vmatmul.mubr.msk.f32.vlgmr.msra.gmra.mrb[6].mxu0 %vm725_vm2, %v1218_v43  ;;  %v1891_v53 = vpop.permute.xlu0 %1890 }
 0x3d9   : > { %2529 = vmatpush3.xpose.msk.msra.mxu0 %vm725_vm2, %v3447_v17  ;;  %2530 = vmatprep.mubr.msk.f32.mxu0 %vm3043_vm1, %v3042_v16 }
 0x3da   : > { %2496 = vmatmul.mubr.msk.f32.vlgmr.msra.gmra.mrb[4].mxu1 %vm725_vm2, %v812_v49  ;;  %2538 = vmatprep.subr.mxu0 %v3042_v16 }
 0x3db   : > { %2499 = vmatpush3.xpose.msk.msra.mxu1 %vm725_vm2, %v889_v39  ;;  %2500 = vmatprep.mubr.msk.f32.mxu1 %vm3043_vm1, %v3042_v16 }
 0x3dc   : > { %2531 = vmatmul.mubr.msk.f32.vlgmr.msra.gmra.mrb[8].mxu0 %vm725_vm2, %v3449_v19  ;;  %2503 = vmatprep.subr.mxu1 %v3042_v16 }
 0x3dd   : > { %2539 = vmatpush3.xpose.msk.msra.mxu0 %vm725_vm2, %v1562_v46  ;;  %2540 = vmatprep.mubr.msk.f32.mxu0 %vm3043_vm1, %v3042_v16 }
 0x3de   : > { %2501 = vmatmul.mubr.msk.f32.vlgmr.msra.gmra.mrb[6].mxu1 %vm725_vm2, %v887_v40  ;;  %2548 = vmatprep.subr.mxu0 %v3042_v16 }
 0x3df   : > { %2505 = vmatprep.mubr.msk.f32.mxu1 %vm3043_vm1, %v3042_v16 }
 0x3e0   : > { %2541 = vmatmul.mubr.msk.f32.vlgmr.msra.gmra.mrb[10].mxu0 %vm725_vm2, %v1560_v48 }
 0x3e1   : > { %2549 = vmatpush3.xpose.msk.msra.mxu0 %vm725_vm2, %v1728_v50  ;;  %2550 = vmatprep.mubr.msk.f32.mxu0 %vm3043_vm1, %v3042_v16 }
 0x3e2   : > { %2558 = vmatprep.subr.mxu0 %v3042_v16 }
 0x3e4   : > { %2551 = vmatmul.mubr.msk.f32.vlgmr.msra.gmra.mrb[12].mxu0 %vm725_vm2, %v1726_v51 }
 0x3e5   : > { %2559 = vmatpush3.xpose.msk.msra.mxu0 %vm725_vm2, %v1893_v52  ;;  %2560 = vmatprep.mubr.msk.f32.mxu0 %vm3043_vm1, %v3042_v16 }
 0x3e8   : > { %2561 = vmatmul.mubr.msk.f32.vlgmr.msra.gmra.mrb[14].mxu0 %vm725_vm2, %v1891_v53 }
 0x4a7   : > { %v1126_v54 = vpop.f32.mrb[4].mxu0 }
 0x4a8   : > { %v2512_v55 = vpop.f32.mrb[5].mxu0  ;;  %v1130_v56 = vsel %vm725_vm2, %v1126_v54, -inf }
 0x4a9   : > { %1131 = vmax.xlane.f32.xlu0 %v1130_v56 }
 0x4ab   : > { %v1291_v57 = vpop.f32.mrb[6].mxu0 }
 0x4ac   : > { %v2522_v58 = vpop.f32.mrb[7].mxu0  ;;  %v1295_v59 = vsel %vm725_vm2, %v1291_v57, -inf }
 0x4ad   : > { %1296 = vmax.xlane.f32.xlu0 %v1295_v59  ;;  %v3530_v60 = vpop.f32.mrb[4].mxu1 }
 0x4ae   : > { %v2497_v61 = vpop.f32.mrb[5].mxu1 }
 0x4af   : > { %v1471_v62 = vpop.f32.mrb[8].mxu0 }
 0x4b0   : > { %v2532_v63 = vpop.f32.mrb[9].mxu0  ;;  %v1475_v6 = vsel %vm725_vm2, %v1471_v62, -inf }
 0x4b1   : > { %v3532_v0 = vpop.f32.mrb[6].mxu1 }
 0x4b2   : > { %v2502_v1 = vpop.f32.mrb[7].mxu1  ;;  %v964_v2 = vsel %vm725_vm2, %v3532_v0, -inf }
 0x4b3   : > { %v1633_v3 = vpop.f32.mrb[10].mxu0  ;;  %965 = vmax.xlane.f32.xlu1 %v964_v2 }
 0x4b4   : > { %v2542_v4 = vpop.f32.mrb[11].mxu0  ;;  %v1637_v5 = vsel %vm725_vm2, %v1633_v3, -inf }
 0x4b5   : > { %1638 = vmax.xlane.f32.xlu0 %v1637_v5 }
 0x4b7   : > { %v1799_v7 = vpop.f32.mrb[12].mxu0  ;;  %1476 = vmax.xlane.f32.xlu1 %v1475_v6 }
 0x4b8   : > { %v2552_v8 = vpop.f32.mrb[13].mxu0  ;;  %v1803_v9 = vsel %vm725_vm2, %v1799_v7, -inf }
 0x4bb   : > { %v1964_v10 = vpop.f32.mrb[14].mxu0  ;;  %1804 = vmax.xlane.f32.xlu1 %v1803_v9 }
 0x4bc   : > { %v2562_v11 = vpop.f32.mrb[15].mxu0  ;;  %v1968_v12 = vsel %vm725_vm2, %v1964_v10, -inf }
 0x4bd   : > { %1969 = vmax.xlane.f32.xlu0 %v1968_v12 }
 0x536   : > { %v1132_v13 = vpop.xlane.xlu0 %1131 }
 0x537   : > { %v1133_v14 = vsub.f32 %v1126_v54, %v1132_v13 }
 0x539   : > { %v1134_v15 = vmul.f32 1.442695, %v1133_v14 }
 0x53a   : > { %v1297_v17 = vpop.xlane.xlu0 %1296 }
 0x53b   : > { %2723 = vpow2.f32 %v1134_v15  ;;  %v1298_v18 = vsub.f32 %v1291_v57, %v1297_v17  ;;  %v2070_v15 = vld [vmem:[#allocation13] sm:$0xff]  ;;  %v2071_v17 = vld [vmem:[#allocation13 + $0x8] sm:$0xff] }
 0x53d   : > { %v1299_v19 = vmul.f32 1.442695, %v1298_v18 }
 0x53f   : > { %2725 = vpow2.f32 %v1299_v19  ;;  %v2603_v19 = vpack.c.bf16 %v2071_v17, %v2070_v15 }
 0x540   : > { %v966_v20 = vpop.xlane.xlu1 %965 }
 0x541   : > { %v967_v47 = vsub.f32 %v3532_v0, %v966_v20  ;;  %2604 = vmatprep.subr.bf16.mxu0 %v2603_v19 }
 0x542   : > { %v1639_v21 = vpop.xlane.xlu0 %1638  ;;  %2606 = vmatpush3.bf16.msra.mxu0 %v2603_v19 }
 0x543   : > { %v1640_v22 = vsub.f32 %v1633_v3, %v1639_v21  ;;  %v968_v48 = vmul.f32 1.442695, %v967_v47  ;;  %v2072_v21 = vld [vmem:[#allocation13 + $0x10] sm:$0xff] }
 0x544   : > { %v1477_v23 = vpop.xlane.xlu1 %1476 }
 0x545   : > { %v3540_v24 = vpop.eup %2723  ;;  %v1641_v25 = vmul.f32 1.442695, %v1640_v22  ;;  %v1478_v26 = vsub.f32 %v1471_v62, %v1477_v23 }
 0x546   : > { %v1136_v27 = vsel %vm725_vm2, %v3540_v24, 0.0 }
 0x547   : > { %2727 = vpow2.f32 %v1641_v25  ;;  %v1479_v28 = vmul.f32 1.442695, %v1478_v26  ;;  %1137 = vadd.xlane.f32.xlu0 %v1136_v27 }
 0x548   : > { %v1805_v29 = vpop.xlane.xlu1 %1804 }
 0x549   : > { %v3544_v30 = vpop.eup %2725  ;;  %2729 = vpow2.f32 %v1479_v28  ;;  %v1806_v31 = vsub.f32 %v1799_v7, %v1805_v29 }
 0x54a   : > { %v1970_v32 = vpop.xlane.xlu0 %1969  ;;  %v1301_v33 = vsel %vm725_vm2, %v3544_v30, 0.0 }
 0x54b   : > { %v1807_v34 = vmul.f32 1.442695, %v1806_v31  ;;  %v1971_v35 = vsub.f32 %v1964_v10, %v1970_v32  ;;  %1302 = vadd.xlane.f32.xlu1 %v1301_v33 }
 0x54d   : > { %2731 = vpow2.f32 %v1807_v34  ;;  %v1972_v36 = vmul.f32 1.442695, %v1971_v35 }
 0x54f   : > { %2733 = vpow2.f32 %v1972_v36 }
 0x550   : > { %2735 = vpow2.f32 %v968_v48 }
 0x551   : > { %v3548_v39 = vpop.eup %2727 }
 0x552   : > { %v1643_v40 = vsel %vm725_vm2, %v3548_v39, 0.0 }
 0x553   : > { %v2730_v41 = vpop.eup %2729  ;;  %1644 = vadd.xlane.f32.xlu1 %v1643_v40 }
 0x554   : > { %v1481_v42 = vsel %vm725_vm2, %v2730_v41, 0.0 }
 0x555   : > { %1482 = vadd.xlane.f32.xlu0 %v1481_v42 }
 0x557   : > { %v3553_v43 = vpop.eup %2731 }
 0x558   : > { %v1809_v44 = vsel %vm725_vm2, %v3553_v43, 0.0 }
 0x559   : > { %v3557_v45 = vpop.eup %2733  ;;  %1810 = vadd.xlane.f32.xlu0 %v1809_v44 }
 0x55a   : > { %v1974_v46 = vsel %vm725_vm2, %v3557_v45, 0.0  ;;  %v2736_v49 = vpop.eup %2735 }
 0x55b   : > { %1975 = vadd.xlane.f32.xlu1 %v1974_v46  ;;  %v970_v50 = vsel %vm725_vm2, %v2736_v49, 0.0 }
 0x56c   : > { %1141 = vrot.lane.b32.xlu1 %v3482_v38, %s3045_s26 }
 0x56f   : > { %976 = vrot.lane.b32.xlu0 %v3482_v38, %s3044_s11 }
 0x573   : > { %1649 = vrot.lane.b32.xlu0 %v3480_v37, %s3044_s11 }
 0x577   : > { %1979 = vrot.lane.b32.xlu0 %v3480_v37, %s3046_s21 }
 0x590   : > { %971 = vadd.xlane.f32.xlu1 %v970_v50 }
 0x5a1   : > { %1306 = vrot.lane.b32.xlu1 %v3482_v38, %s3046_s21 }
 0x5a5   : > { %1814 = vrot.lane.b32.xlu1 %v3480_v37, %s3045_s26 }
 0x5d4   : > { %v1138_v51 = vpop.xlane.xlu0 %1137 }
 0x5d8   : > { %v1303_v55 = vpop.xlane.xlu1 %1302 }
 0x5e0   : > { %v1645_v56 = vpop.xlane.xlu1 %1644 }
 0x5e2   : > { %v1483_v52 = vpop.xlane.xlu0 %1482 }
 0x5e6   : > { %v1811_v53 = vpop.xlane.xlu0 %1810 }
 0x5e8   : > { %v1976_v57 = vpop.xlane.xlu1 %1975 }
 0x5ea   : > { %v977_v54 = vpop.permute.xlu0 %976 }
 0x5eb   : > { %2504 = vmatpush3.msra.mxu1 %v977_v54 }
 0x5ec   : > { %2513 = vmatprep.subr.mxu1 %v3042_v16  ;;  %v1142_v58 = vpop.permute.xlu1 %1141 }
 0x5ee   : > { %v1650_v6 = vpop.permute.xlu0 %1649 }
 0x5f2   : > { %v1980_v11 = vpop.permute.xlu0 %1979 }
 0x61d   : > { %v972_v59 = vpop.xlane.xlu1 %971 }
 0x61e   : > { %2737 = vrcp.f32 %v972_v59 }
 0x61f   : > { %2739 = vrcp.f32 %v1138_v51 }
 0x620   : > { %2741 = vrcp.f32 %v1303_v55 }
 0x621   : > { %2743 = vrcp.f32 %v1483_v52  ;;  %v1307_v1 = vpop.permute.xlu1 %1306 }
 0x622   : > { %2745 = vrcp.f32 %v1645_v56 }
 0x623   : > { %2747 = vrcp.f32 %v1811_v53 }
 0x624   : > { %2749 = vrcp.f32 %v1976_v57 }
 0x628   : > { %v2738_v61 = vpop.eup %2737 }
 0x629   : > { %v974_v38 = vmul.f32 %v2738_v61, %v2736_v49  ;;  %v2740_v62 = vpop.eup %2739 }
 0x62a   : > { %v1140_v63 = vmul.f32 %v2740_v62, %v3540_v24  ;;  %v2742_v0 = vpop.eup %2741 }
 0x62b   : > { %2506 = vmatmul.mubr.msk.f32.vlgmr.msra.gmra.mrb[8].mxu1 %vm725_vm2, %v974_v38  ;;  %v1305_v2 = vmul.f32 %v2742_v0, %v3544_v30  ;;  %v2744_v3 = vpop.eup %2743 }
 0x62c   : > { %2514 = vmatpush3.msra.mxu1 %v1142_v58  ;;  %2515 = vmatprep.mubr.msk.f32.mxu1 %vm3043_vm1, %v3042_v16  ;;  %v1485_v4 = vmul.f32 %v2744_v3, %v2730_v41  ;;  %v2746_v5 = vpop.eup %2745 }
 0x62d   : > { %2523 = vmatprep.subr.mxu1 %v3042_v16  ;;  %v1647_v7 = vmul.f32 %v2746_v5, %v3548_v39  ;;  %v2748_v8 = vpop.eup %2747 }
 0x62e   : > { %v1813_v9 = vmul.f32 %v2748_v8, %v3553_v43  ;;  %v2750_v10 = vpop.eup %2749 }
 0x62f   : > { %2516 = vmatmul.mubr.msk.f32.vlgmr.msra.gmra.mrb[10].mxu1 %vm725_vm2, %v1140_v63  ;;  %v1978_v12 = vmul.f32 %v2750_v10, %v3557_v45 }
 0x630   : > { %2524 = vmatpush3.msra.mxu1 %v1307_v1  ;;  %2525 = vmatprep.mubr.msk.f32.mxu1 %vm3043_vm1, %v3042_v16 }
 0x631   : > { %2533 = vmatprep.subr.mxu1 %v3042_v16 }
 0x633   : > { %2526 = vmatmul.mubr.msk.f32.vlgmr.msra.gmra.mrb[12].mxu1 %vm725_vm2, %v1305_v2 }
 0x634   : > { %2534 = vmatpush3.msra.mxu1 %v3480_v37  ;;  %2535 = vmatprep.mubr.msk.f32.mxu1 %vm3043_vm1, %v3042_v16  ;;  %v1815_v37 = vpop.permute.xlu1 %1814 }
 0x635   : > { %2543 = vmatprep.subr.mxu1 %v3042_v16 }
 0x637   : > { %2536 = vmatmul.mubr.msk.f32.vlgmr.msra.gmra.mrb[14].mxu1 %vm725_vm2, %v1485_v4 }
 0x638   : > { %2544 = vmatpush3.msra.mxu1 %v1650_v6  ;;  %2545 = vmatprep.mubr.msk.f32.mxu1 %vm3043_vm1, %v3042_v16 }
 0x639   : > { %2553 = vmatprep.subr.mxu1 %v3042_v16 }
 0x63b   : > { %2546 = vmatmul.mubr.msk.f32.vlgmr.msra.gmra.mrb[16].mxu1 %vm725_vm2, %v1647_v7 }
 0x63c   : > { %2554 = vmatpush3.msra.mxu1 %v1815_v37  ;;  %2555 = vmatprep.mubr.msk.f32.mxu1 %vm3043_vm1, %v3042_v16 }
 0x63d   : > { %2563 = vmatprep.subr.mxu1 %v3042_v16 }
 0x63f   : > { %2556 = vmatmul.mubr.msk.f32.vlgmr.msra.gmra.mrb[18].mxu1 %vm725_vm2, %v1813_v9 }
 0x640   : > { %2564 = vmatpush3.msra.mxu1 %v1980_v11  ;;  %2565 = vmatprep.mubr.msk.f32.mxu1 %vm3043_vm1, %v3042_v16  ;;  %v2073_v16 = vld [vmem:[#allocation13 + $0x18] sm:$0xff] }
 0x641   : > { %v2607_v23 = vpack.c.bf16 %v2073_v16, %v2072_v21 }
 0x643   : > { %2566 = vmatmul.mubr.msk.f32.vlgmr.msra.gmra.mrb[20].mxu1 %vm725_vm2, %v1978_v12  ;;  %2608 = vmatprep.subr.bf16.mxu0 %v2607_v23 }
 0x644   : > { %2610 = vmatpush3.bf16.msra.mxu0 %v2607_v23 }
 0x6fe   : > { %v1048_v13 = vpop.f32.mrb[8].mxu1 }
 0x6ff   : > { %1383 = vrot.lane.b32.xlu1 %v1048_v13, %s3047_s12  ;;  %v2507_v14 = vpop.f32.mrb[9].mxu1 }
 0x702   : > { %v1213_v18 = vpop.f32.mrb[10].mxu1 }
 0x703   : > { %1387 = vrot.lane.b32.xlu0 %v1213_v18, %s3048_s30  ;;  %v2517_v20 = vpop.f32.mrb[11].mxu1 }
 0x706   : > { %v1378_v22 = vpop.f32.mrb[12].mxu1 }
 0x707   : > { %1391 = vrot.lane.b32.xlu0 %v1378_v22, %s3049_s3  ;;  %v2527_v24 = vpop.f32.mrb[13].mxu1 }
 0x70a   : > { %v1555_v25 = vpop.f32.mrb[14].mxu1 }
 0x70b   : > { %v2537_v26 = vpop.f32.mrb[15].mxu1 }
 0x70e   : > { %v1721_v27 = vpop.f32.mrb[16].mxu1 }
 0x70f   : > { %2056 = vrot.lane.b32.xlu1 %v1721_v27, %s3047_s12  ;;  %v2547_v28 = vpop.f32.mrb[17].mxu1 }
 0x712   : > { %v1886_v29 = vpop.f32.mrb[18].mxu1 }
 0x713   : > { %2060 = vrot.lane.b32.xlu1 %v1886_v29, %s3048_s30  ;;  %v2557_v30 = vpop.f32.mrb[19].mxu1 }
 0x716   : > { %v2051_v31 = vpop.f32.mrb[20].mxu1 }
 0x717   : > { %2064 = vrot.lane.b32.xlu0 %v2051_v31, %s3049_s3  ;;  %v2567_v32 = vpop.f32.mrb[21].mxu1 }
 0x771   : > { %v1384_v33 = vpop.permute.xlu1 %1383 }
 0x772   : > { %v1394_v35 = vsel %vm725_vm2, %v3530_v60, %v1384_v33  ;;  %v2387_v60 = vld [vmem:[%s3677_s7] ss:$0 sm:$0xff] }
 0x775   : > { %v1388_v34 = vpop.permute.xlu0 %1387 }
 0x776   : > { %v1396_v36 = vsel %vm1395_vm3, %v1394_v35, %v1388_v34 }
 0x779   : > { %v1392_v39 = vpop.permute.xlu0 %1391 }
 0x77a   : > { %v1398_v40 = vsel %vm1397_vm4, %v1396_v36, %v1392_v39 }
 0x77b   : > { %2576 = vmatprep.mubr.msk.f32.mxu0 %vm469_vm0, %v1398_v40 }
 0x781   : > { %v2057_v41 = vpop.permute.xlu1 %2056 }
 0x782   : > { %v2067_v43 = vsel %vm725_vm2, %v1555_v25, %v2057_v41 }
 0x785   : > { %v2061_v42 = vpop.permute.xlu1 %2060 }
 0x786   : > { %v2068_v44 = vsel %vm1395_vm3, %v2067_v43, %v2061_v42 }
 0x789   : > { %v2065_v45 = vpop.permute.xlu0 %2064 }
 0x78a   : > { %v2069_v46 = vsel %vm1397_vm4, %v2068_v44, %v2065_v45 }
 0x78b   : > { %2577 = vmatmul.mubr.msk.f32.vlgmr.msra.gmra.mrb[16].mxu0 %vm469_vm0, %v2069_v46 }
 0x85e   : > { %v2578_v47 = vpop.f32.mrb[16].mxu0 }
 0x85f   : > { %v2159_v48 = vadd.f32 %v2578_v47, %v2387_v60  ;;  %v2153_v49 = vpop.f32.mrb[17].mxu0 }
 0x860   : > { %v2154_v50 = vadd.f32 %v2387_v60, %v2153_v49 }
 0x861   : > { %2163 = vst.msk [vmem:[%s458_s8 + $0x8] sm:$0xff] %vm469_vm0, %v2159_v48 }
 0x862   : > { %2162 = vst.msk [vmem:[%s458_s8] sm:$0xff] %vm469_vm0, %v2154_v50 }
 0x863   : > { %2966 = shalt.err (!%p2963_p12)
}
 0x864   : > { %s2967_s25 = scalar_lea.hbm %s3623_s22, 256  ;;  %s2971_s21 = scalar_lea.hbm %s3741_s15, 512 }
 0x865   : > { %p2968_p8 = scmp.ne.s32.totalorder %s3623_s22, %s2967_s25  ;;  %p2972_p1 = scmp.lt.u32.totalorder %s3623_s22, %s3741_s15 }
 0x866   : > { %p2973_p6 = scmp.lt.u32.totalorder %s2971_s21, %s2967_s25  ;;  %p2975_p5 = scmp.lt.u32.totalorder %s2967_s25, %s3623_s22 }
 0x867   : > { %p2969_p10 = pnand %p2968_p8, %p3742_p2 }
 0x868   : > { %p2974_p3 = por %p2973_p6, %p2972_p1 }
 0x869   : > { %p2970_p0 = pneg %p2969_p10 }
 0x86a   : > { %p2976_p4 = por %p2975_p5, %p2974_p3 }
 0x86c   : > { %p2977_p11 = pnand %p2976_p4, %p2970_p0 }
 0x86e   : > { %2980 = shalt.err (!%p2977_p11)
}
 0x86f   : > { %s3051_s23 = smov 128  }
 0x870   : > { %2633 = dma.vmem_to_hbm [thread:$0]  (%p3742_p2), %s3618_s10, 256, %s3623_s22, %s2165_s16, %s3051_s23, %s3051_s23, %s3047_s12  }
 0x871 PF: > { %s3743_s14 = sld [smem:[#allocation20_spill]]  ;;  %s3744_s8 = sld [smem:[#allocation22_spill]] }
 0x872   : > { %s3745_s18 = sld [smem:[#allocation21_spill]] }
 0x877   : > { %s2193_s1 = sand.u32 1, %s3743_s14   ;;  %p3746_p13 = scmp.ne.s32.totalorder %s3744_s8, 0 }
 0x878   : > { %p3747_p7 = scmp.ge.s32.totalorder %s3745_s18, 2  ;;  %s2194_s24 = scalar_lea.sflag [#allocation4], %s2193_s1 }
 0x87a   : > { %p2659_p9 = pnand %p3747_p7, %p3746_p13 }
 0x87c   : > { %3014 = dma.done.wait (!%p2659_p9), %s2194_s24, 256  }
 0x87d   : > { %3016 = vsyncadd (!%p2659_p9), %s2194_s24, 4294967040  ;;  %s3748_s30 = sld [smem:[#allocation23_spill]]  ;;  %s3749_s17 = sld [smem:[#allocation25_spill]] }
 0x87e   : > { %s3750_s27 = smov %s3023_s28  ;;  %s3751_s28 = smov %s3027_s29 }
 0x883   : > { %p26_p12 = scmp.ge.s32.totalorder %s3748_s30, 4   ;;  %s3752_s29 = smov %s3749_s17 }
 0x885   :  { %28 = sbr.rel (!%p26_p12) target bundleno = 14 (0xe), region = 137 }
 0x88c   :  { %2199 = vsyncpa [#allocation3], 1 }
 0x88d   :  { %2201 = vsyncpa [#allocation3 + $0x1], 1 }
 0x88e   :  { %2202 = vsyncpa [#allocation6], 1 }
 0x88f   :  { %2204 = vsyncpa [#allocation6 + $0x1], 1 }
 0x890   :  { %2205 = vsyncpa [#allocation9], 1 }
 0x891   :  { %2206 = vsyncpa [#allocation12], 1 }
 0x892   :  { %2207 = vsyncpa [#allocation4], 1 }
 0x893   :  { %2209 = vsyncpa [#allocation4 + $0x1], 1 }

// kernel: tpu_custom_call.1
= control target key start
LH: loop header
LB: loop body
LE: loop exit
PB: predicated region body
PF: predicated region fallthrough
CT: control target
= control target key end

     0   :  { %s3670_s0 = inlined_call_operand.hbm [shape: f32[4,8,32], index: 0, kind: input, shape index: {}]   ;;  %s3671_s1 = inlined_call_operand.hbm [shape: f32[4,8,32], index: 1, kind: input, shape index: {}]   ;;  %s3672_s2 = inlined_call_operand.hbm [shape: f32[4,8,32], index: 2, kind: input, shape index: {}]   ;;  %s3673_s3 = inlined_call_operand.hbm [shape: f32[32,32], index: 3, kind: input, shape index: {}]   ;;  %s3674_s4 = inlined_call_operand.hbm [shape: f32[32,32], index: 4, kind: input, shape index: {}]   ;;  %s3675_s5 = inlined_call_operand.hbm [shape: f32[32,32], index: 5, kind: input, shape index: {}]   ;;  %s3676_s6 = inlined_call_operand.hbm [shape: f32[32,32], index: 6, kind: input, shape index: {}]   ;;  %s3677_s7 = inlined_call_operand.vmem [shape: f32[1,32], index: 7, kind: input, shape index: {}]   ;;  %s3678_s8 = inlined_call_operand.hbm [shape: f32[4,8,32], index: 8, kind: output, shape index: {}]  }
   0x1   :  { %3704 = sst [smem:[#allocation26_spill]] %s3671_s1 }
   0x2   :  { %3705 = sst [smem:[#allocation27_spill]] %s3673_s3 }
   0x3   :  { %3706 = sst [smem:[#allocation28_spill]] %s3675_s5 }
   0x4   :  { %3707 = sst [smem:[#allocation29_spill]] %s3678_s8 }
   0x5   :  { %13 = vsyncpa [#allocation3], 0 }
   0x6   :  { %15 = vsyncpa [#allocation3 + $0x1], 0 }
   0x7   :  { %16 = vsyncpa [#allocation6], 0 }
   0x8   :  { %18 = vsyncpa [#allocation6 + $0x1], 0 }
   0x9   :  { %19 = vsyncpa [#allocation9], 0 }
   0xa   :  { %20 = vsyncpa [#allocation12], 0 }
   0xb   :  { %21 = vsyncpa [#allocation4], 0 }
   0xc   :  { %23 = vsyncpa [#allocation4 + $0x1], 0  ;;  %s3097_s27 = smov 0   ;;  %s3099_s28 = smov 0  }
   0xd   :  { %s3101_s29 = smov 0   ;;  %s3103_s30 = smov 0  }
   0xe LB: > { %3708 = sst [smem:[#allocation20_spill]] %s3019_s27  ;;  %s3118_s9 = sadd.s32 4294967295, %s3031_s30   ;;  %s3031_s30 = sphi %s3103_s30, %s3748_s30   ;;  %s3027_s29 = sphi %s3101_s29, %s3752_s29   ;;  %s3023_s28 = sphi %s3099_s28, %s3751_s28   ;;  %s3019_s27 = sphi %s3097_s27, %s3750_s27  }
   0xf   : > { %3709 = sst [smem:[#allocation21_spill]] %s3031_s30  ;;  %s2332_s10 = sadd.s32 4294967294, %s3031_s30  }
  0x10   : > { %p49_p0 = scmp.ne.s32.totalorder %s3023_s28, %s3019_s27  ;;  %p3679_p1 = scmp.eq.s32.totalorder %s3118_s9, 0 }
  0x11   : > { %p236_p3 = scmp.eq.s32.totalorder %s2332_s10, 1  ;;  %p2333_p5 = scmp.ge.s32.totalorder %s3031_s30, 1 }
  0x12   : > { %p3127_p4 = por %p3679_p1, %p49_p0  ;;  %p243_p7 = scmp.lt.s32.totalorder %s3031_s30, 3 }
  0x13   : > { %p3132_p6 = por %p236_p3, %p49_p0  ;;  %s3033_s14 = smov [#allocation8]  }
  0x14   : > { %s3710_s11 = scalar_select %p3127_p4, 1, 0 }
  0x15   : > { %s3711_s12 = scalar_select %p3132_p6, 1, 0 }
  0x16   : > { %p3137_p8 = pnand %p2333_p5, %p243_p7  ;;  %s255_s15 = sshll.u32 %s3033_s14, 4  ;;  %s3141_s15 = int_to_ptr.vmem [resolvable:$true] %s255_s15 }
  0x17   : > { %3712 = sst [smem:[#allocation22_spill]] %s3711_s12  ;;  %s3034_s17 = smov [#allocation11]  }
  0x18   : > { %s3713_s13 = scalar_select %p3137_p8, 1, 0 }
  0x19   : > { %p2635_p9 = pneg %p3137_p8  ;;  %s281_s18 = sshll.u32 %s3034_s17, 4  ;;  %s3152_s18 = int_to_ptr.vmem [resolvable:$true] %s281_s18 }
  0x1a   : > { %s3715_s3 = sld [smem:[#allocation27_spill]] }
  0x1b   : > { %p3148_p11 = pnand %p2635_p9, %p3679_p1 }
  0x1d   : > { %s3714_s16 = scalar_select %p3148_p11, 1, 0 }
  0x1e   : > { %p3162_p13 = pneg %p3148_p11 }
  0x20   : > { %s2751_s21 = scalar_lea.hbm %s3715_s3, 512 }
  0x21   : > { %p2752_p12 = scmp.ne.s32.totalorder %s3715_s3, %s2751_s21  ;;  %p2758_p5 = scmp.lt.u32.totalorder %s2751_s21, %s3715_s3 }
  0x22   : > { %s3716_s24 = scalar_select %p3162_p13, 1, 0 }
  0x23   : > { %p2754_p0 = pnand %p3162_p13, %p2752_p12 }
  0x25   : > { %p2755_p3 = pneg %p2754_p0 }
  0x27   : > { %p2760_p7 = pnand %p2758_p5, %p2755_p3 }
  0x29   : > { %2763 = shalt.err (!%p2760_p7)
}
  0x2a   : > { %s2764_s10 = scalar_lea.vmem %s3141_s15, 512  ;;  %p2772_p2 = scmp.lt.s32.totalorder %s3141_s15, %s3141_s15 }
  0x2b   : > { %p2765_p9 = scmp.ne.s32.totalorder %s3141_s15, %s2764_s10  ;;  %p2773_p6 = scmp.lt.s32.totalorder %s2764_s10, %s2764_s10 }
  0x2d   : > { %p2767_p10 = pnand %p2765_p9, %p3162_p13  ;;  %p2774_p12 = por %p2773_p6, %p2772_p2 }
  0x2f   : > { %p2768_p1 = pneg %p2767_p10 }
  0x31   : > { %p2775_p0 = pnand %p2774_p12, %p2768_p1 }
  0x33   : > { %2778 = shalt.err (!%p2775_p0)
}
  0x34   : > { %s3682_s14 = smov 128   ;;  %s3684_s17 = smov 8  }
  0x35   : > { %2638 = dma.hbm_to_vmem [thread:$0]  (!%p3148_p11), %s3715_s3, 512, %s3141_s15, [#allocation9], %s3682_s14, %s3682_s14, %s3684_s17  }
  0x36   : > { %s3717_s5 = sld [smem:[#allocation28_spill]] }
  0x3c   : > { %s2779_s23 = scalar_lea.hbm %s3717_s5, 512 }
  0x3d   : > { %p2780_p1 = scmp.ne.s32.totalorder %s3717_s5, %s2779_s23  ;;  %p2786_p10 = scmp.lt.u32.totalorder %s2779_s23, %s3717_s5 }
  0x3f   : > { %p2782_p2 = pnand %p2780_p1, %p3162_p13 }
  0x41   : > { %p2783_p6 = pneg %p2782_p2 }
  0x43   : > { %p2788_p3 = pnand %p2786_p10, %p2783_p6 }
  0x45   : > { %2791 = shalt.err (!%p2788_p3)
}
  0x46   : > { %s2792_s15 = scalar_lea.vmem %s3152_s18, 512  ;;  %p2800_p12 = scmp.lt.s32.totalorder %s3152_s18, %s3152_s18 }
  0x47   : > { %p2793_p5 = scmp.ne.s32.totalorder %s3152_s18, %s2792_s15  ;;  %p2801_p0 = scmp.lt.s32.totalorder %s2792_s15, %s2792_s15 }
  0x49   : > { %p2795_p7 = pnand %p2793_p5, %p3162_p13  ;;  %p2802_p1 = por %p2801_p0, %p2800_p12 }
  0x4b   : > { %p2796_p9 = pneg %p2795_p7 }
  0x4d   : > { %p2803_p2 = pnand %p2802_p1, %p2796_p9 }
  0x4f   : > { %2806 = shalt.err (!%p2803_p2)
}
  0x50   : > { %2644 = dma.hbm_to_vmem [thread:$0]  (!%p3148_p11), %s3717_s5, 512, %s3152_s18, [#allocation12], %s3682_s14, %s3682_s14, %s3684_s17  }
  0x51   : > { %s3213_s20 = sadd.s32 1, %s3031_s30   ;;  %s36_s21 = sadd.s32 1, %s3027_s29 }
  0x52   : > { %3718 = sst [smem:[#allocation23_spill]] %s3213_s20  ;;  %s33_s22 = ssub.s32 %s3031_s30, %s3213_s20 }
  0x53   : > { %p43_p6 = scmp.ne.s32.totalorder %s3027_s29, %s3023_s28  ;;  %p34_p10 = scmp.eq.s32.totalorder %s33_s22, 0 }
  0x54   : > { %p44_p3 = scmp.eq.s32.totalorder %s3031_s30, 0  ;;  %p3719_p5 = scmp.eq.s32.totalorder %s3118_s9, 1 }
  0x55   : > { %p2666_p9 = scmp.lt.s32.totalorder %s3031_s30, 2  ;;  %s3681_s26 = sand.u32 1, %s3027_s29  }
  0x56   : > { %p3223_p7 = por %p3719_p5, %p43_p6  ;;  %p45_p12 = por %p44_p3, %p43_p6 }
  0x57   : > { %s3229_s25 = scalar_select %p34_p10, %s3027_s29, %s36_s21  }
  0x58   : > { %s3720_s23 = scalar_select %p3223_p7, 1, 0 }
  0x59   : > { %3722 = sst [smem:[#allocation25_spill]] %s3229_s25  ;;  %s3234_s18 = sshll.u32 %s3681_s26, 4 }
  0x5a   : > { %3721 = sst [smem:[#allocation24_spill]] %s3720_s23  ;;  %s3237_s10 = sshll.u32 %s3031_s30, 8 }
  0x5b   : > { %p3239_p0 = pnand %p2666_p9, %p45_p12  ;;  %s332_s12 = sand.u32 1, %s3031_s30  }
  0x5c   : > { %s3724_s1 = sld [smem:[#allocation26_spill]]  ;;  %s336_s26 = scalar_lea.vmem [#allocation5], %s3234_s18 }
  0x5d   : > { %s3723_s15 = scalar_select %p3239_p0, 1, 0 }
  0x5e   : > { %s343_s14 = sshll.u32 %s336_s26, 4  ;;  %s3037_s17 = smov [#allocation10]   ;;  %s3251_s14 = int_to_ptr.vmem [resolvable:$true] %s343_s14 }
  0x5f   : > { %s3253_s3 = sshll.u32 %s3037_s17, 4  ;;  %s3255_s5 = scalar_lea.sflag [#allocation6], %s332_s12  ;;  %s269_s3 = int_to_ptr.vmem [resolvable:$true] %s3253_s3 }
  0x60   : > { %p3261_p2 = pneg %p3239_p0 }
  0x62   : > { %s3248_s21 = scalar_lea.hbm %s3724_s1, %s3237_s10  ;;  %s2812_s20 = scalar_lea.hbm %s3724_s1, 512 }
  0x63   : > { %s2807_s25 = scalar_lea.hbm %s3248_s21, 256  ;;  %p2813_p3 = scmp.lt.u32.totalorder %s3248_s21, %s3724_s1 }
  0x64   : > { %p2808_p1 = scmp.ne.s32.totalorder %s3248_s21, %s2807_s25  ;;  %p2814_p5 = scmp.lt.u32.totalorder %s2812_s20, %s2807_s25 }
  0x65   : > { %s3725_s19 = scalar_select %p3261_p2, 1, 0 }
  0x66   : > { %p2810_p6 = pnand %p3261_p2, %p2808_p1  ;;  %p2815_p9 = por %p2814_p5, %p2813_p3 }
  0x67   : > { %p2816_p12 = scmp.lt.u32.totalorder %s2807_s25, %s3248_s21 }
  0x68   : > { %p2811_p10 = pneg %p2810_p6 }
  0x69   : > { %p2817_p7 = por %p2816_p12, %p2815_p9 }
  0x6b   : > { %p2818_p4 = pnand %p2817_p7, %p2811_p10 }
  0x6d   : > { %2821 = shalt.err (!%p2818_p4)
}
  0x6e   : > { %s2822_s12 = scalar_lea.vmem %s3251_s14, 256  ;;  %s3038_s22 = smov [#allocation5]  }
  0x6f   : > { %p2823_p1 = scmp.ne.s32.totalorder %s3251_s14, %s2822_s12  ;;  %s2827_s26 = sshll.u32 %s3038_s22, 4  ;;  %s2828_s26 = int_to_ptr.vmem [resolvable:$false] %s2827_s26 }
  0x70   : > { %s2829_s30 = scalar_lea.vmem %s2828_s26, 512  ;;  %p2830_p11 = scmp.lt.s32.totalorder %s3251_s14, %s2828_s26 }
  0x71   : > { %p2825_p6 = pnand %p2823_p1, %p3261_p2  ;;  %p2831_p13 = scmp.lt.s32.totalorder %s2829_s30, %s2822_s12 }
  0x73   : > { %p2826_p8 = pneg %p2825_p6  ;;  %p2832_p3 = por %p2831_p13, %p2830_p11 }
  0x75   : > { %p2833_p5 = pnand %p2832_p3, %p2826_p8 }
  0x77   : > { %2836 = shalt.err (!%p2833_p5)
}
  0x78   : > { %s3726_s20 = smov 8   ;;  %s3727_s25 = smov 128  }
  0x79   : > { %2654 = dma.hbm_to_vmem [thread:$0]  (!%p3239_p0), %s3248_s21, 256, %s3251_s14, %s3255_s5, %s3727_s25, %s3727_s25, %s3726_s20  }
  0x7a   : > { %s2837_s26 = scalar_lea.hbm %s3674_s4, 512  ;;  %p3728_p8 = scmp.ne.s32.totalorder %s3716_s24, 0 }
  0x7b   : > { %p2838_p4 = scmp.ne.s32.totalorder %s3674_s4, %s2837_s26  ;;  %p2844_p7 = scmp.lt.u32.totalorder %s2837_s26, %s3674_s4 }
  0x7d   : > { %p2840_p11 = pnand %p2838_p4, %p3728_p8 }
  0x7f   : > { %p2841_p13 = pneg %p2840_p11 }
  0x81   : > { %p2846_p10 = pnand %p2844_p7, %p2841_p13 }
  0x83   : > { %2849 = shalt.err (!%p2846_p10)
}
  0x84   : > { %s2850_s8 = scalar_lea.vmem %s269_s3, 512  ;;  %p2858_p6 = scmp.lt.s32.totalorder %s269_s3, %s269_s3 }
  0x85   : > { %p2851_p9 = scmp.ne.s32.totalorder %s269_s3, %s2850_s8  ;;  %p2859_p3 = scmp.lt.s32.totalorder %s2850_s8, %s2850_s8 }
  0x87   : > { %p2853_p12 = pnand %p2851_p9, %p3728_p8  ;;  %p2860_p5 = por %p2859_p3, %p2858_p6 }
  0x89   : > { %p2854_p1 = pneg %p2853_p12 }
  0x8b   : > { %p2861_p0 = pnand %p2860_p5, %p2854_p1 }
  0x8d   : > { %2864 = shalt.err (!%p2861_p0)
}
  0x8e   : > { %p3729_p4 = scmp.ne.s32.totalorder %s3714_s16, 0  ;;  %s3039_s14 = smov [#allocation13]  }
  0x8f   : > { %s294_s21 = sshll.u32 %s3039_s14, 4  ;;  %s2865_s8 = scalar_lea.hbm %s3676_s6, 512  ;;  %s295_s21 = int_to_ptr.vmem [resolvable:$true] %s294_s21 }
  0x90   : > { %2641 = dma.hbm_to_vmem [thread:$0]  (!%p3729_p4), %s3674_s4, 512, %s269_s3, [#allocation9], %s3727_s25, %s3727_s25, %s3726_s20  }
  0x91   : > { %p2866_p0 = scmp.ne.s32.totalorder %s3676_s6, %s2865_s8  ;;  %p2872_p7 = scmp.lt.u32.totalorder %s2865_s8, %s3676_s6 }
  0x93   : > { %p2868_p11 = pnand %p2866_p0, %p3728_p8 }
  0x95   : > { %p2869_p13 = pneg %p2868_p11 }
  0x97   : > { %p2874_p10 = pnand %p2872_p7, %p2869_p13 }
  0x99   : > { %2877 = shalt.err (!%p2874_p10)
}
  0x9a   : > { %s2878_s3 = scalar_lea.vmem %s295_s21, 512  ;;  %p2886_p6 = scmp.lt.s32.totalorder %s295_s21, %s295_s21 }
  0x9b   : > { %p2879_p9 = scmp.ne.s32.totalorder %s295_s21, %s2878_s3  ;;  %p2887_p3 = scmp.lt.s32.totalorder %s2878_s3, %s2878_s3 }
  0x9d   : > { %p2881_p12 = pnand %p2879_p9, %p3728_p8  ;;  %p2888_p5 = por %p2887_p3, %p2886_p6 }
  0x9f   : > { %p2882_p1 = pneg %p2881_p12 }
  0xa1   : > { %p2889_p2 = pnand %p2888_p5, %p2882_p1 }
  0xa3   : > { %2892 = shalt.err (!%p2889_p2)
}
  0xa4   : > { %2647 = dma.hbm_to_vmem [thread:$0]  (!%p3729_p4), %s3676_s6, 512, %s295_s21, [#allocation12], %s3727_s25, %s3727_s25, %s3726_s20  }
  0xa5   : > { %s3335_s14 = scalar_lea.hbm %s3670_s0, %s3237_s10  ;;  %s315_s16 = scalar_lea.vmem [#allocation2], %s3234_s18 }
  0xa6   : > { %s322_s17 = sshll.u32 %s315_s16, 4  ;;  %s3730_s22 = sand.u32 1, %s3027_s29   ;;  %s3338_s17 = int_to_ptr.vmem [resolvable:$true] %s322_s17 }
  0xa7   : > { %s3342_s8 = scalar_lea.sflag [#allocation3], %s3730_s22  ;;  %s2893_s26 = scalar_lea.hbm %s3335_s14, 256 }
  0xa8   : > { %p2894_p2 = scmp.ne.s32.totalorder %s3335_s14, %s2893_s26  ;;  %p3731_p8 = scmp.ne.s32.totalorder %s3725_s19, 0 }
  0xa9   : > { %s2898_s30 = scalar_lea.hbm %s3670_s0, 512  ;;  %p2899_p11 = scmp.lt.u32.totalorder %s3335_s14, %s3670_s0 }
  0xaa   : > { %p2896_p4 = pnand %p2894_p2, %p3731_p8  ;;  %p2900_p13 = scmp.lt.u32.totalorder %s2898_s30, %s2893_s26 }
  0xab   : > { %p2902_p10 = scmp.lt.u32.totalorder %s2893_s26, %s3335_s14 }
  0xac   : > { %p2897_p0 = pneg %p2896_p4  ;;  %p2901_p7 = por %p2900_p13, %p2899_p11 }
  0xae   : > { %p2903_p9 = por %p2902_p10, %p2901_p7 }
  0xb0   : > { %p2904_p12 = pnand %p2903_p9, %p2897_p0 }
  0xb2   : > { %2907 = shalt.err (!%p2904_p12)
}
  0xb3   : > { %s2908_s1 = scalar_lea.vmem %s3338_s17, 256  ;;  %s3040_s24 = smov [#allocation2]  }
  0xb4   : > { %p2909_p1 = scmp.ne.s32.totalorder %s3338_s17, %s2908_s1  ;;  %s2913_s27 = sshll.u32 %s3040_s24, 4  ;;  %s2914_s27 = int_to_ptr.vmem [resolvable:$false] %s2913_s27 }
  0xb5   : > { %s2915_s16 = scalar_lea.vmem %s2914_s27, 512  ;;  %p2916_p5 = scmp.lt.s32.totalorder %s3338_s17, %s2914_s27 }
  0xb6   : > { %p2911_p6 = pnand %p2909_p1, %p3731_p8  ;;  %p2917_p2 = scmp.lt.s32.totalorder %s2915_s16, %s2908_s1 }
  0xb8   : > { %p2912_p3 = pneg %p2911_p6  ;;  %p2918_p4 = por %p2917_p2, %p2916_p5 }
  0xba   : > { %p2919_p11 = pnand %p2918_p4, %p2912_p3 }
  0xbc   : > { %2922 = shalt.err (!%p2919_p11)
}
  0xbd   : > { %p3732_p0 = scmp.ne.s32.totalorder %s3723_s15, 0  ;;  %s3373_s21 = scalar_lea.hbm %s3672_s2, %s3237_s10 }
  0xbe   : > { %s357_s12 = scalar_lea.vmem [#allocation7], %s3234_s18  ;;  %s2923_s3 = scalar_lea.hbm %s3373_s21, 256 }
  0xbf   : > { %2651 = dma.hbm_to_vmem [thread:$0]  (!%p3732_p0), %s3335_s14, 256, %s3338_s17, %s3342_s8, %s3727_s25, %s3727_s25, %s3726_s20  }
  0xc0   : > { %s364_s30 = sshll.u32 %s357_s12, 4  ;;  %p2924_p13 = scmp.ne.s32.totalorder %s3373_s21, %s2923_s3  ;;  %s3376_s30 = int_to_ptr.vmem [resolvable:$true] %s364_s30 }
  0xc1   : > { %s2928_s17 = scalar_lea.hbm %s3672_s2, 512  ;;  %p2929_p9 = scmp.lt.u32.totalorder %s3373_s21, %s3672_s2 }
  0xc2   : > { %p2926_p7 = pnand %p2924_p13, %p3731_p8  ;;  %p2930_p12 = scmp.lt.u32.totalorder %s2928_s17, %s2923_s3 }
  0xc3   : > { %p2932_p6 = scmp.lt.u32.totalorder %s2923_s3, %s3373_s21 }
  0xc4   : > { %p2927_p10 = pneg %p2926_p7  ;;  %p2931_p1 = por %p2930_p12, %p2929_p9 }
  0xc6   : > { %p2933_p3 = por %p2932_p6, %p2931_p1 }
  0xc8   : > { %p2934_p5 = pnand %p2933_p3, %p2927_p10 }
  0xca   : > { %2937 = shalt.err (!%p2934_p5)
}
  0xcb   : > { %s2938_s18 = scalar_lea.vmem %s3376_s30, 256  ;;  %s3041_s1 = smov [#allocation7]  }
  0xcc   : > { %p2939_p2 = scmp.ne.s32.totalorder %s3376_s30, %s2938_s18  ;;  %s2943_s24 = sshll.u32 %s3041_s1, 4  ;;  %s2944_s24 = int_to_ptr.vmem [resolvable:$false] %s2943_s24 }
  0xcd   : > { %s2945_s27 = scalar_lea.vmem %s2944_s24, 512  ;;  %p2946_p13 = scmp.lt.s32.totalorder %s3376_s30, %s2944_s24 }
  0xce   : > { %p2941_p4 = pnand %p2939_p2, %p3731_p8  ;;  %p2947_p7 = scmp.lt.s32.totalorder %s2945_s27, %s2938_s18 }
  0xd0   : > { %p2942_p11 = pneg %p2941_p4  ;;  %p2948_p9 = por %p2947_p7, %p2946_p13 }
  0xd2   : > { %p2949_p12 = pnand %p2948_p9, %p2942_p11 }
  0xd4   : > { %2952 = shalt.err (!%p2949_p12)
}
  0xd5   : > { %2657 = dma.hbm_to_vmem [thread:$0]  (!%p3732_p0), %s3373_s21, 256, %s3376_s30, %s3255_s5, %s3727_s25, %s3727_s25, %s3726_s20  }
  0xd6   : > { %p3733_p8 = scmp.ne.s32.totalorder %s3713_s13, 0 }
  0xd7   : > { %s3406_s19 = sand.u32 (!%p3733_p8), 1, %s3023_s28   ;;  %p3734_p10 = scmp.ne.s32.totalorder (!%p3733_p8), %s3710_s11, 0 }
  0xd8   : > { %376 = sbr.rel (%p3733_p8) target bundleno = 2161 (0x871), region = 52  ;;  %s3409_s16 = sshll.u32 (!%p3733_p8), %s3406_s19, 4 }
  0xd9   : > { %s379_s15 = scalar_lea.sflag (!%p3733_p8), [#allocation3], %s3406_s19  ;;  %s382_s22 = scalar_lea.vmem (!%p3733_p8), [#allocation2], %s3409_s16 }
  0xdf   : > { %2998 = dma.done.wait (%p3734_p10), %s379_s15, 256  }
  0xe0   : > { %3000 = vsyncadd (%p3734_p10), %s379_s15, 4294967040  ;;  %s387_s5 = sand.u32 1, %s3118_s9   ;;  %s391_s20 = scalar_lea.vmem [#allocation5], %s3409_s16 }
  0xe1   : > { %s388_s13 = scalar_lea.sflag [#allocation6], %s387_s5 }
  0xe2   : > { %3002 = dma.done.wait (%p3734_p10), %s388_s13, 512  }
  0xe3   : > { %3004 = vsyncadd (%p3734_p10), %s388_s13, 4294966784  ;;  %s400_s25 = scalar_lea.vmem [#allocation7], %s3409_s16  ;;  %p3735_p0 = scmp.eq.s32.totalorder %s3118_s9, 0 }
  0xe5   : > { %3006 = dma.done.wait (%p3735_p0), [#allocation9], 1024   ;;  %p3736_p1 = pmov %p3735_p0 }
  0xe6   : > { %p3737_p6 = pmov %p3735_p0 }
  0xe7   : > { %3008 = vsyncadd (%p3736_p1), [#allocation9], 4294966272 }
  0xe8   : > { %3010 = dma.done.wait (%p3737_p6), [#allocation12], 1024   ;;  %p3738_p3 = pmov %p3735_p0 }
  0xe9   : > { %v553_v0 = vld [vmem:[#allocation10] sm:$0xff]  ;;  %v554_v1 = vld [vmem:[#allocation10 + $0x8] sm:$0xff]  ;;  %vm469_vm0 = vcmask 261120   ;;  %v555_v5 = vld [vmem:[#allocation10 + $0x10] sm:$0xff]  ;;  %v3042_v16 = vmov 0.0   ;;  %vm3043_vm1 = vmmov 0  }
  0xea   : > { %3012 = vsyncadd (%p3738_p3), [#allocation12], 4294966272  ;;  %v465_v2 = vld [vmem:[#allocation8] sm:$0xff]  ;;  %v2587_v3 = vpack.c.bf16 %v554_v1, %v553_v0  ;;  %v466_v4 = vld [vmem:[#allocation8 + $0x8] sm:$0xff]  ;;  %vm725_vm2 = vcmask 64512   ;;  %s3044_s11 = smov 120  }
  0xeb   : > { %v556_v6 = vld [vmem:[#allocation10 + $0x18] sm:$0xff]  ;;  %v2579_v7 = vpack.c.bf16 %v466_v4, %v465_v2  ;;  %v467_v9 = vld [vmem:[#allocation8 + $0x10] sm:$0xff]  ;;  %s3045_s26 = smov 112   ;;  %s3046_s21 = smov 104   ;;  %v640_v21 = vld [vmem:[#allocation11] sm:$0xff]  ;;  %vm1395_vm3 = vcmask 130048  }
  0xec   : > { %v2591_v8 = vpack.c.bf16 %v556_v6, %v555_v5  ;;  %v468_v10 = vld [vmem:[#allocation8 + $0x18] sm:$0xff]  ;;  %v551_v11 = vld [vmem:[%s391_s20] sm:$0xff]  ;;  %2588 = vmatprep.subr.bf16.mxu1 %v2587_v3  ;;  %v641_v22 = vld [vmem:[#allocation11 + $0x8] sm:$0xff]  ;;  %s3047_s12 = smov 8   ;;  %s3048_s30 = smov 16   ;;  %vm1397_vm4 = vcmask 195584  }
  0xed   : > { %v2583_v12 = vpack.c.bf16 %v468_v10, %v467_v9  ;;  %2474 = vmatprep.mubr.msk.f32.mxu1 %vm469_vm0, %v551_v11  ;;  %v463_v13 = vld [vmem:[%s382_s22] sm:$0xff]  ;;  %2590 = vmatpush3.bf16.msra.mxu1 %v2587_v3  ;;  %v552_v14 = vld [vmem:[%s391_s20 + $0x8] sm:$0xff]  ;;  %v2595_v24 = vpack.c.bf16 %v641_v22, %v640_v21  ;;  %s3049_s3 = smov 24   ;;  %s3739_s17 = sld [smem:[#allocation24_spill]] }
  0xee   : > { %2580 = vmatprep.subr.bf16.mxu0 %v2579_v7  ;;  %2592 = vmatprep.subr.bf16.mxu1 %v2591_v8  ;;  %v464_v15 = vld [vmem:[%s382_s22 + $0x8] sm:$0xff]  ;;  %v642_v23 = vld [vmem:[#allocation11 + $0x10] sm:$0xff]  ;;  %s458_s8 = scalar_lea.vmem [#allocation14], %s3409_s16  ;;  %s2398_s18 = sshll.u32 %s3118_s9, 8 }
  0xef   : > { %2582 = vmatpush3.bf16.msra.mxu0 %v2579_v7  ;;  %2463 = vmatprep.mubr.msk.f32.mxu0 %vm469_vm0, %v463_v13  ;;  %v643_v25 = vld [vmem:[#allocation11 + $0x18] sm:$0xff]  ;;  %v638_v26 = vld [vmem:[%s400_s25] sm:$0xff]  ;;  %s2178_s10 = sshll.u32 %s458_s8, 4  ;;  %s3740_s27 = sld [smem:[#allocation29_spill]]  ;;  %s3618_s10 = int_to_ptr.vmem [resolvable:$true] %s2178_s10 }
  0xf0   : > { %2584 = vmatprep.subr.bf16.mxu0 %v2583_v12  ;;  %v2599_v27 = vpack.c.bf16 %v643_v25, %v642_v23  ;;  %v639_v28 = vld [vmem:[%s400_s25 + $0x8] sm:$0xff]  ;;  %s2165_s16 = scalar_lea.sflag [#allocation4], %s3406_s19  ;;  %s2953_s9 = scalar_lea.vmem %s3618_s10, 256 }
  0xf1   : > { %2594 = vmatpush3.bf16.msra.mxu1 %v2591_v8  ;;  %p2954_p5 = scmp.ne.s32.totalorder %s3618_s10, %s2953_s9  ;;  %s3050_s5 = smov [#allocation14]  }
  0xf2   : > { %2488 = vmatprep.subr.mxu1 %v3042_v16  ;;  %s2957_s13 = sshll.u32 %s3050_s5, 4  ;;  %s2958_s13 = int_to_ptr.vmem [resolvable:$false] %s2957_s13 }
  0xf3   : > { %2586 = vmatpush3.bf16.msra.mxu0 %v2583_v12  ;;  %p3742_p2 = scmp.ne.s32.totalorder %s3739_s17, 0  ;;  %s2959_s20 = scalar_lea.vmem %s2958_s13, 512 }
  0xf4   : > { %2475 = vmatmul.mubr.msk.f32.vlgmr.msra.gmra.mrb[0].mxu1 %vm469_vm0, %v552_v14  ;;  %2596 = vmatprep.subr.bf16.mxu0 %v2595_v24  ;;  %p2960_p13 = scmp.lt.s32.totalorder %s3618_s10, %s2958_s13  ;;  %p2961_p7 = scmp.lt.s32.totalorder %s2959_s20, %s2953_s9 }
  0xf5   : > { %2490 = vmatprep.mubr.msk.f32.mxu1 %vm3043_vm1, %v3042_v16  ;;  %s3741_s15 = smov %s3740_s27  ;;  %s3623_s22 = scalar_lea.hbm %s3740_s27, %s2398_s18 }
  0xf6   : > { %2464 = vmatmul.mubr.msk.f32.vlgmr.msra.gmra.mrb[0].mxu0 %vm469_vm0, %v464_v15  ;;  %p2955_p4 = pnand %p2954_p5, %p3742_p2  ;;  %p2962_p9 = por %p2961_p7, %p2960_p13 }
  0xf7   : > { %2485 = vmatprep.mubr.msk.f32.mxu0 %vm469_vm0, %v638_v26  ;;  %2598 = vmatpush3.bf16.msra.mxu0 %v2595_v24 }
  0xf8   : > { %2600 = vmatprep.subr.bf16.mxu0 %v2599_v27  ;;  %p2956_p11 = pneg %p2955_p4 }
  0xfa   : > { %p2963_p12 = pnand %p2962_p9, %p2956_p11 }
  0xfb   : > { %2602 = vmatpush3.bf16.msra.mxu0 %v2599_v27 }
  0xfc   : > { %2508 = vmatprep.subr.mxu0 %v3042_v16 }
  0xfe   : > { %2486 = vmatmul.mubr.msk.f32.vlgmr.msra.gmra.mrb[2].mxu0 %vm469_vm0, %v639_v28 }
  0xff   : > { %2510 = vmatprep.mubr.msk.f32.mxu0 %vm3043_vm1, %v3042_v16 }
 0x1c7   : > { %v3447_v17 = vpop.f32.mrb[0].mxu1 }
 0x1c8   : > { %v629_v18 = vpop.f32.mrb[1].mxu1 }
 0x1c9   : > { %v3449_v19 = vpop.f32.mrb[0].mxu0  ;;  %888 = vrot.lane.b32.xlu1 %v629_v18, %s3044_s11  ;;  %2489 = vmatpush3.xpose.msk.msra.mxu1 %vm725_vm2, %v629_v18 }
 0x1ca   : > { %v542_v20 = vpop.f32.mrb[1].mxu0  ;;  %2493 = vmatprep.subr.mxu1 %v3042_v16 }
 0x1cc   : > { %2491 = vmatmul.mubr.msk.f32.vlgmr.msra.gmra.mrb[2].mxu1 %vm725_vm2, %v542_v20 }
 0x1cd   : > { %886 = vrot.lane.b32.xlu1 %v542_v20, %s3044_s11  ;;  %2495 = vmatprep.mubr.msk.f32.mxu1 %vm3043_vm1, %v3042_v16 }
 0x1d1   : > { %1052 = vrot.lane.b32.xlu1 %v542_v20, %s3045_s26  ;;  %v3480_v37 = vpop.f32.mrb[2].mxu0 }
 0x1d2   : > { %v3482_v38 = vpop.f32.mrb[3].mxu0 }
 0x1d3   : > { %2494 = vmatpush3.msra.mxu1 %v3482_v38 }
 0x1d4   : > { %2498 = vmatprep.subr.mxu1 %v3042_v16 }
 0x1d5   : > { %1219 = vrot.lane.b32.xlu1 %v629_v18, %s3046_s21 }
 0x1d9   : > { %1217 = vrot.lane.b32.xlu1 %v542_v20, %s3046_s21 }
 0x1dd   : > { %1561 = vrot.lane.b32.xlu1 %v3447_v17, %s3044_s11 }
 0x1e1   : > { %1559 = vrot.lane.b32.xlu1 %v3449_v19, %s3044_s11 }
 0x1e5   : > { %1727 = vrot.lane.b32.xlu1 %v3447_v17, %s3045_s26 }
 0x1e9   : > { %1892 = vrot.lane.b32.xlu1 %v3447_v17, %s3046_s21 }
 0x23b   : > { %v889_v39 = vpop.permute.xlu1 %888 }
 0x23f   : > { %v887_v40 = vpop.permute.xlu1 %886 }
 0x243   : > { %v1053_v41 = vpop.permute.xlu1 %1052 }
 0x247   : > { %v1220_v42 = vpop.permute.xlu1 %1219 }
 0x24b   : > { %v1218_v43 = vpop.permute.xlu1 %1217 }
 0x24f   : > { %v1562_v46 = vpop.permute.xlu1 %1561 }
 0x253   : > { %v1560_v48 = vpop.permute.xlu1 %1559 }
 0x257   : > { %v1728_v50 = vpop.permute.xlu1 %1727 }
 0x25b   : > { %v1893_v52 = vpop.permute.xlu1 %1892 }
 0x29f   : > { %v798_v29 = vpop.f32.mrb[2].mxu1 }
 0x2a0   : > { %v2492_v30 = vpop.f32.mrb[3].mxu1  ;;  %v802_v31 = vsel %vm725_vm2, %v798_v29, -inf }
 0x2a1   : > { %803 = vmax.xlane.f32.xlu0 %v802_v31 }
 0x32e   : > { %v804_v32 = vpop.xlane.xlu0 %803 }
 0x32f   : > { %v805_v33 = vsub.f32 %v798_v29, %v804_v32 }
 0x331   : > { %v806_v34 = vmul.f32 1.442695, %v805_v33 }
 0x333   : > { %2719 = vpow2.f32 %v806_v34 }
 0x33d   : > { %v2720_v35 = vpop.eup %2719 }
 0x33e   : > { %v808_v36 = vsel %vm725_vm2, %v2720_v35, 0.0 }
 0x33f   : > { %809 = vadd.xlane.f32.xlu0 %v808_v36 }
 0x355   : > { %1054 = vrot.lane.b32.xlu0 %v629_v18, %s3045_s26 }
 0x359   : > { %1725 = vrot.lane.b32.xlu0 %v3449_v19, %s3045_s26 }
 0x35d   : > { %1890 = vrot.lane.b32.xlu0 %v3449_v19, %s3046_s21 }
 0x3cc   : > { %v810_v44 = vpop.xlane.xlu0 %809 }
 0x3cd   : > { %2721 = vrcp.f32 %v810_v44 }
 0x3d0   : > { %v1055_v45 = vpop.permute.xlu0 %1054 }
 0x3d1   : > { %2509 = vmatpush3.xpose.msk.msra.mxu0 %vm725_vm2, %v1055_v45 }
 0x3d2   : > { %2518 = vmatprep.subr.mxu0 %v3042_v16 }
 0x3d4   : > { %2511 = vmatmul.mubr.msk.f32.vlgmr.msra.gmra.mrb[4].mxu0 %vm725_vm2, %v1053_v41  ;;  %v1726_v51 = vpop.permute.xlu0 %1725 }
 0x3d5   : > { %2519 = vmatpush3.xpose.msk.msra.mxu0 %vm725_vm2, %v1220_v42  ;;  %2520 = vmatprep.mubr.msk.f32.mxu0 %vm3043_vm1, %v3042_v16 }
 0x3d6   : > { %2528 = vmatprep.subr.mxu0 %v3042_v16 }
 0x3d7   : > { %v2722_v47 = vpop.eup %2721 }
 0x3d8   : > { %v812_v49 = vmul.f32 %v2722_v47, %v2720_v35  ;;  %2521 = vmatmul.mubr.msk.f32.vlgmr.msra.gmra.mrb[6].mxu0 %vm725_vm2, %v1218_v43  ;;  %v1891_v53 = vpop.permute.xlu0 %1890 }
 0x3d9   : > { %2529 = vmatpush3.xpose.msk.msra.mxu0 %vm725_vm2, %v3447_v17  ;;  %2530 = vmatprep.mubr.msk.f32.mxu0 %vm3043_vm1, %v3042_v16 }
 0x3da   : > { %2496 = vmatmul.mubr.msk.f32.vlgmr.msra.gmra.mrb[4].mxu1 %vm725_vm2, %v812_v49  ;;  %2538 = vmatprep.subr.mxu0 %v3042_v16 }
 0x3db   : > { %2499 = vmatpush3.xpose.msk.msra.mxu1 %vm725_vm2, %v889_v39  ;;  %2500 = vmatprep.mubr.msk.f32.mxu1 %vm3043_vm1, %v3042_v16 }
 0x3dc   : > { %2531 = vmatmul.mubr.msk.f32.vlgmr.msra.gmra.mrb[8].mxu0 %vm725_vm2, %v3449_v19  ;;  %2503 = vmatprep.subr.mxu1 %v3042_v16 }
 0x3dd   : > { %2539 = vmatpush3.xpose.msk.msra.mxu0 %vm725_vm2, %v1562_v46  ;;  %2540 = vmatprep.mubr.msk.f32.mxu0 %vm3043_vm1, %v3042_v16 }
 0x3de   : > { %2501 = vmatmul.mubr.msk.f32.vlgmr.msra.gmra.mrb[6].mxu1 %vm725_vm2, %v887_v40  ;;  %2548 = vmatprep.subr.mxu0 %v3042_v16 }
 0x3df   : > { %2505 = vmatprep.mubr.msk.f32.mxu1 %vm3043_vm1, %v3042_v16 }
 0x3e0   : > { %2541 = vmatmul.mubr.msk.f32.vlgmr.msra.gmra.mrb[10].mxu0 %vm725_vm2, %v1560_v48 }
 0x3e1   : > { %2549 = vmatpush3.xpose.msk.msra.mxu0 %vm725_vm2, %v1728_v50  ;;  %2550 = vmatprep.mubr.msk.f32.mxu0 %vm3043_vm1, %v3042_v16 }
 0x3e2   : > { %2558 = vmatprep.subr.mxu0 %v3042_v16 }
 0x3e4   : > { %2551 = vmatmul.mubr.msk.f32.vlgmr.msra.gmra.mrb[12].mxu0 %vm725_vm2, %v1726_v51 }
 0x3e5   : > { %2559 = vmatpush3.xpose.msk.msra.mxu0 %vm725_vm2, %v1893_v52  ;;  %2560 = vmatprep.mubr.msk.f32.mxu0 %vm3043_vm1, %v3042_v16 }
 0x3e8   : > { %2561 = vmatmul.mubr.msk.f32.vlgmr.msra.gmra.mrb[14].mxu0 %vm725_vm2, %v1891_v53 }
 0x4a7   : > { %v1126_v54 = vpop.f32.mrb[4].mxu0 }
 0x4a8   : > { %v2512_v55 = vpop.f32.mrb[5].mxu0  ;;  %v1130_v56 = vsel %vm725_vm2, %v1126_v54, -inf }
 0x4a9   : > { %1131 = vmax.xlane.f32.xlu0 %v1130_v56 }
 0x4ab   : > { %v1291_v57 = vpop.f32.mrb[6].mxu0 }
 0x4ac   : > { %v2522_v58 = vpop.f32.mrb[7].mxu0  ;;  %v1295_v59 = vsel %vm725_vm2, %v1291_v57, -inf }
 0x4ad   : > { %1296 = vmax.xlane.f32.xlu0 %v1295_v59  ;;  %v3530_v60 = vpop.f32.mrb[4].mxu1 }
 0x4ae   : > { %v2497_v61 = vpop.f32.mrb[5].mxu1 }
 0x4af   : > { %v1471_v62 = vpop.f32.mrb[8].mxu0 }
 0x4b0   : > { %v2532_v63 = vpop.f32.mrb[9].mxu0  ;;  %v1475_v6 = vsel %vm725_vm2, %v1471_v62, -inf }
 0x4b1   : > { %v3532_v0 = vpop.f32.mrb[6].mxu1 }
 0x4b2   : > { %v2502_v1 = vpop.f32.mrb[7].mxu1  ;;  %v964_v2 = vsel %vm725_vm2, %v3532_v0, -inf }
 0x4b3   : > { %v1633_v3 = vpop.f32.mrb[10].mxu0  ;;  %965 = vmax.xlane.f32.xlu1 %v964_v2 }
 0x4b4   : > { %v2542_v4 = vpop.f32.mrb[11].mxu0  ;;  %v1637_v5 = vsel %vm725_vm2, %v1633_v3, -inf }
 0x4b5   : > { %1638 = vmax.xlane.f32.xlu0 %v1637_v5 }
 0x4b7   : > { %v1799_v7 = vpop.f32.mrb[12].mxu0  ;;  %1476 = vmax.xlane.f32.xlu1 %v1475_v6 }
 0x4b8   : > { %v2552_v8 = vpop.f32.mrb[13].mxu0  ;;  %v1803_v9 = vsel %vm725_vm2, %v1799_v7, -inf }
 0x4bb   : > { %v1964_v10 = vpop.f32.mrb[14].mxu0  ;;  %1804 = vmax.xlane.f32.xlu1 %v1803_v9 }
 0x4bc   : > { %v2562_v11 = vpop.f32.mrb[15].mxu0  ;;  %v1968_v12 = vsel %vm725_vm2, %v1964_v10, -inf }
 0x4bd   : > { %1969 = vmax.xlane.f32.xlu0 %v1968_v12 }
 0x536   : > { %v1132_v13 = vpop.xlane.xlu0 %1131 }
 0x537   : > { %v1133_v14 = vsub.f32 %v1126_v54, %v1132_v13 }
 0x539   : > { %v1134_v15 = vmul.f32 1.442695, %v1133_v14 }
 0x53a   : > { %v1297_v17 = vpop.xlane.xlu0 %1296 }
 0x53b   : > { %2723 = vpow2.f32 %v1134_v15  ;;  %v1298_v18 = vsub.f32 %v1291_v57, %v1297_v17  ;;  %v2070_v15 = vld [vmem:[#allocation13] sm:$0xff]  ;;  %v2071_v17 = vld [vmem:[#allocation13 + $0x8] sm:$0xff] }
 0x53d   : > { %v1299_v19 = vmul.f32 1.442695, %v1298_v18 }
 0x53f   : > { %2725 = vpow2.f32 %v1299_v19  ;;  %v2603_v19 = vpack.c.bf16 %v2071_v17, %v2070_v15 }
 0x540   : > { %v966_v20 = vpop.xlane.xlu1 %965 }
 0x541   : > { %v967_v47 = vsub.f32 %v3532_v0, %v966_v20  ;;  %2604 = vmatprep.subr.bf16.mxu0 %v2603_v19 }
 0x542   : > { %v1639_v21 = vpop.xlane.xlu0 %1638  ;;  %2606 = vmatpush3.bf16.msra.mxu0 %v2603_v19 }
 0x543   : > { %v1640_v22 = vsub.f32 %v1633_v3, %v1639_v21  ;;  %v968_v48 = vmul.f32 1.442695, %v967_v47  ;;  %v2072_v21 = vld [vmem:[#allocation13 + $0x10] sm:$0xff] }
 0x544   : > { %v1477_v23 = vpop.xlane.xlu1 %1476 }
 0x545   : > { %v3540_v24 = vpop.eup %2723  ;;  %v1641_v25 = vmul.f32 1.442695, %v1640_v22  ;;  %v1478_v26 = vsub.f32 %v1471_v62, %v1477_v23 }
 0x546   : > { %v1136_v27 = vsel %vm725_vm2, %v3540_v24, 0.0 }
 0x547   : > { %2727 = vpow2.f32 %v1641_v25  ;;  %v1479_v28 = vmul.f32 1.442695, %v1478_v26  ;;  %1137 = vadd.xlane.f32.xlu0 %v1136_v27 }
 0x548   : > { %v1805_v29 = vpop.xlane.xlu1 %1804 }
 0x549   : > { %v3544_v30 = vpop.eup %2725  ;;  %2729 = vpow2.f32 %v1479_v28  ;;  %v1806_v31 = vsub.f32 %v1799_v7, %v1805_v29 }
 0x54a   : > { %v1970_v32 = vpop.xlane.xlu0 %1969  ;;  %v1301_v33 = vsel %vm725_vm2, %v3544_v30, 0.0 }
 0x54b   : > { %v1807_v34 = vmul.f32 1.442695, %v1806_v31  ;;  %v1971_v35 = vsub.f32 %v1964_v10, %v1970_v32  ;;  %1302 = vadd.xlane.f32.xlu1 %v1301_v33 }
 0x54d   : > { %2731 = vpow2.f32 %v1807_v34  ;;  %v1972_v36 = vmul.f32 1.442695, %v1971_v35 }
 0x54f   : > { %2733 = vpow2.f32 %v1972_v36 }
 0x550   : > { %2735 = vpow2.f32 %v968_v48 }
 0x551   : > { %v3548_v39 = vpop.eup %2727 }
 0x552   : > { %v1643_v40 = vsel %vm725_vm2, %v3548_v39, 0.0 }
 0x553   : > { %v2730_v41 = vpop.eup %2729  ;;  %1644 = vadd.xlane.f32.xlu1 %v1643_v40 }
 0x554   : > { %v1481_v42 = vsel %vm725_vm2, %v2730_v41, 0.0 }
 0x555   : > { %1482 = vadd.xlane.f32.xlu0 %v1481_v42 }
 0x557   : > { %v3553_v43 = vpop.eup %2731 }
 0x558   : > { %v1809_v44 = vsel %vm725_vm2, %v3553_v43, 0.0 }
 0x559   : > { %v3557_v45 = vpop.eup %2733  ;;  %1810 = vadd.xlane.f32.xlu0 %v1809_v44 }
 0x55a   : > { %v1974_v46 = vsel %vm725_vm2, %v3557_v45, 0.0  ;;  %v2736_v49 = vpop.eup %2735 }
 0x55b   : > { %1975 = vadd.xlane.f32.xlu1 %v1974_v46  ;;  %v970_v50 = vsel %vm725_vm2, %v2736_v49, 0.0 }
 0x56c   : > { %1141 = vrot.lane.b32.xlu1 %v3482_v38, %s3045_s26 }
 0x56f   : > { %976 = vrot.lane.b32.xlu0 %v3482_v38, %s3044_s11 }
 0x573   : > { %1649 = vrot.lane.b32.xlu0 %v3480_v37, %s3044_s11 }
 0x577   : > { %1979 = vrot.lane.b32.xlu0 %v3480_v37, %s3046_s21 }
 0x590   : > { %971 = vadd.xlane.f32.xlu1 %v970_v50 }
 0x5a1   : > { %1306 = vrot.lane.b32.xlu1 %v3482_v38, %s3046_s21 }
 0x5a5   : > { %1814 = vrot.lane.b32.xlu1 %v3480_v37, %s3045_s26 }
 0x5d4   : > { %v1138_v51 = vpop.xlane.xlu0 %1137 }
 0x5d8   : > { %v1303_v55 = vpop.xlane.xlu1 %1302 }
 0x5e0   : > { %v1645_v56 = vpop.xlane.xlu1 %1644 }
 0x5e2   : > { %v1483_v52 = vpop.xlane.xlu0 %1482 }
 0x5e6   : > { %v1811_v53 = vpop.xlane.xlu0 %1810 }
 0x5e8   : > { %v1976_v57 = vpop.xlane.xlu1 %1975 }
 0x5ea   : > { %v977_v54 = vpop.permute.xlu0 %976 }
 0x5eb   : > { %2504 = vmatpush3.msra.mxu1 %v977_v54 }
 0x5ec   : > { %2513 = vmatprep.subr.mxu1 %v3042_v16  ;;  %v1142_v58 = vpop.permute.xlu1 %1141 }
 0x5ee   : > { %v1650_v6 = vpop.permute.xlu0 %1649 }
 0x5f2   : > { %v1980_v11 = vpop.permute.xlu0 %1979 }
 0x61d   : > { %v972_v59 = vpop.xlane.xlu1 %971 }
 0x61e   : > { %2737 = vrcp.f32 %v972_v59 }
 0x61f   : > { %2739 = vrcp.f32 %v1138_v51 }
 0x620   : > { %2741 = vrcp.f32 %v1303_v55 }
 0x621   : > { %2743 = vrcp.f32 %v1483_v52  ;;  %v1307_v1 = vpop.permute.xlu1 %1306 }
 0x622   : > { %2745 = vrcp.f32 %v1645_v56 }
 0x623   : > { %2747 = vrcp.f32 %v1811_v53 }
 0x624   : > { %2749 = vrcp.f32 %v1976_v57 }
 0x628   : > { %v2738_v61 = vpop.eup %2737 }
 0x629   : > { %v974_v38 = vmul.f32 %v2738_v61, %v2736_v49  ;;  %v2740_v62 = vpop.eup %2739 }
 0x62a   : > { %v1140_v63 = vmul.f32 %v2740_v62, %v3540_v24  ;;  %v2742_v0 = vpop.eup %2741 }
 0x62b   : > { %2506 = vmatmul.mubr.msk.f32.vlgmr.msra.gmra.mrb[8].mxu1 %vm725_vm2, %v974_v38  ;;  %v1305_v2 = vmul.f32 %v2742_v0, %v3544_v30  ;;  %v2744_v3 = vpop.eup %2743 }
 0x62c   : > { %2514 = vmatpush3.msra.mxu1 %v1142_v58  ;;  %2515 = vmatprep.mubr.msk.f32.mxu1 %vm3043_vm1, %v3042_v16  ;;  %v1485_v4 = vmul.f32 %v2744_v3, %v2730_v41  ;;  %v2746_v5 = vpop.eup %2745 }
 0x62d   : > { %2523 = vmatprep.subr.mxu1 %v3042_v16  ;;  %v1647_v7 = vmul.f32 %v2746_v5, %v3548_v39  ;;  %v2748_v8 = vpop.eup %2747 }
 0x62e   : > { %v1813_v9 = vmul.f32 %v2748_v8, %v3553_v43  ;;  %v2750_v10 = vpop.eup %2749 }
 0x62f   : > { %2516 = vmatmul.mubr.msk.f32.vlgmr.msra.gmra.mrb[10].mxu1 %vm725_vm2, %v1140_v63  ;;  %v1978_v12 = vmul.f32 %v2750_v10, %v3557_v45 }
 0x630   : > { %2524 = vmatpush3.msra.mxu1 %v1307_v1  ;;  %2525 = vmatprep.mubr.msk.f32.mxu1 %vm3043_vm1, %v3042_v16 }
 0x631   : > { %2533 = vmatprep.subr.mxu1 %v3042_v16 }
 0x633   : > { %2526 = vmatmul.mubr.msk.f32.vlgmr.msra.gmra.mrb[12].mxu1 %vm725_vm2, %v1305_v2 }
 0x634   : > { %2534 = vmatpush3.msra.mxu1 %v3480_v37  ;;  %2535 = vmatprep.mubr.msk.f32.mxu1 %vm3043_vm1, %v3042_v16  ;;  %v1815_v37 = vpop.permute.xlu1 %1814 }
 0x635   : > { %2543 = vmatprep.subr.mxu1 %v3042_v16 }
 0x637   : > { %2536 = vmatmul.mubr.msk.f32.vlgmr.msra.gmra.mrb[14].mxu1 %vm725_vm2, %v1485_v4 }
 0x638   : > { %2544 = vmatpush3.msra.mxu1 %v1650_v6  ;;  %2545 = vmatprep.mubr.msk.f32.mxu1 %vm3043_vm1, %v3042_v16 }
 0x639   : > { %2553 = vmatprep.subr.mxu1 %v3042_v16 }
 0x63b   : > { %2546 = vmatmul.mubr.msk.f32.vlgmr.msra.gmra.mrb[16].mxu1 %vm725_vm2, %v1647_v7 }
 0x63c   : > { %2554 = vmatpush3.msra.mxu1 %v1815_v37  ;;  %2555 = vmatprep.mubr.msk.f32.mxu1 %vm3043_vm1, %v3042_v16 }
 0x63d   : > { %2563 = vmatprep.subr.mxu1 %v3042_v16 }
 0x63f   : > { %2556 = vmatmul.mubr.msk.f32.vlgmr.msra.gmra.mrb[18].mxu1 %vm725_vm2, %v1813_v9 }
 0x640   : > { %2564 = vmatpush3.msra.mxu1 %v1980_v11  ;;  %2565 = vmatprep.mubr.msk.f32.mxu1 %vm3043_vm1, %v3042_v16  ;;  %v2073_v16 = vld [vmem:[#allocation13 + $0x18] sm:$0xff] }
 0x641   : > { %v2607_v23 = vpack.c.bf16 %v2073_v16, %v2072_v21 }
 0x643   : > { %2566 = vmatmul.mubr.msk.f32.vlgmr.msra.gmra.mrb[20].mxu1 %vm725_vm2, %v1978_v12  ;;  %2608 = vmatprep.subr.bf16.mxu0 %v2607_v23 }
 0x644   : > { %2610 = vmatpush3.bf16.msra.mxu0 %v2607_v23 }
 0x6fe   : > { %v1048_v13 = vpop.f32.mrb[8].mxu1 }
 0x6ff   : > { %1383 = vrot.lane.b32.xlu1 %v1048_v13, %s3047_s12  ;;  %v2507_v14 = vpop.f32.mrb[9].mxu1 }
 0x702   : > { %v1213_v18 = vpop.f32.mrb[10].mxu1 }
 0x703   : > { %1387 = vrot.lane.b32.xlu0 %v1213_v18, %s3048_s30  ;;  %v2517_v20 = vpop.f32.mrb[11].mxu1 }
 0x706   : > { %v1378_v22 = vpop.f32.mrb[12].mxu1 }
 0x707   : > { %1391 = vrot.lane.b32.xlu0 %v1378_v22, %s3049_s3  ;;  %v2527_v24 = vpop.f32.mrb[13].mxu1 }
 0x70a   : > { %v1555_v25 = vpop.f32.mrb[14].mxu1 }
 0x70b   : > { %v2537_v26 = vpop.f32.mrb[15].mxu1 }
 0x70e   : > { %v1721_v27 = vpop.f32.mrb[16].mxu1 }
 0x70f   : > { %2056 = vrot.lane.b32.xlu1 %v1721_v27, %s3047_s12  ;;  %v2547_v28 = vpop.f32.mrb[17].mxu1 }
 0x712   : > { %v1886_v29 = vpop.f32.mrb[18].mxu1 }
 0x713   : > { %2060 = vrot.lane.b32.xlu1 %v1886_v29, %s3048_s30  ;;  %v2557_v30 = vpop.f32.mrb[19].mxu1 }
 0x716   : > { %v2051_v31 = vpop.f32.mrb[20].mxu1 }
 0x717   : > { %2064 = vrot.lane.b32.xlu0 %v2051_v31, %s3049_s3  ;;  %v2567_v32 = vpop.f32.mrb[21].mxu1 }
 0x771   : > { %v1384_v33 = vpop.permute.xlu1 %1383 }
 0x772   : > { %v1394_v35 = vsel %vm725_vm2, %v3530_v60, %v1384_v33  ;;  %v2387_v60 = vld [vmem:[%s3677_s7] ss:$0 sm:$0xff] }
 0x775   : > { %v1388_v34 = vpop.permute.xlu0 %1387 }
 0x776   : > { %v1396_v36 = vsel %vm1395_vm3, %v1394_v35, %v1388_v34 }
 0x779   : > { %v1392_v39 = vpop.permute.xlu0 %1391 }
 0x77a   : > { %v1398_v40 = vsel %vm1397_vm4, %v1396_v36, %v1392_v39 }
 0x77b   : > { %2576 = vmatprep.mubr.msk.f32.mxu0 %vm469_vm0, %v1398_v40 }
 0x781   : > { %v2057_v41 = vpop.permute.xlu1 %2056 }
 0x782   : > { %v2067_v43 = vsel %vm725_vm2, %v1555_v25, %v2057_v41 }
 0x785   : > { %v2061_v42 = vpop.permute.xlu1 %2060 }
 0x786   : > { %v2068_v44 = vsel %vm1395_vm3, %v2067_v43, %v2061_v42 }
 0x789   : > { %v2065_v45 = vpop.permute.xlu0 %2064 }
 0x78a   : > { %v2069_v46 = vsel %vm1397_vm4, %v2068_v44, %v2065_v45 }
 0x78b   : > { %2577 = vmatmul.mubr.msk.f32.vlgmr.msra.gmra.mrb[16].mxu0 %vm469_vm0, %v2069_v46 }
 0x85e   : > { %v2578_v47 = vpop.f32.mrb[16].mxu0 }
 0x85f   : > { %v2159_v48 = vadd.f32 %v2578_v47, %v2387_v60  ;;  %v2153_v49 = vpop.f32.mrb[17].mxu0 }
 0x860   : > { %v2154_v50 = vadd.f32 %v2387_v60, %v2153_v49 }
 0x861   : > { %2163 = vst.msk [vmem:[%s458_s8 + $0x8] sm:$0xff] %vm469_vm0, %v2159_v48 }
 0x862   : > { %2162 = vst.msk [vmem:[%s458_s8] sm:$0xff] %vm469_vm0, %v2154_v50 }
 0x863   : > { %2966 = shalt.err (!%p2963_p12)
}
 0x864   : > { %s2967_s25 = scalar_lea.hbm %s3623_s22, 256  ;;  %s2971_s21 = scalar_lea.hbm %s3741_s15, 512 }
 0x865   : > { %p2968_p8 = scmp.ne.s32.totalorder %s3623_s22, %s2967_s25  ;;  %p2972_p1 = scmp.lt.u32.totalorder %s3623_s22, %s3741_s15 }
 0x866   : > { %p2973_p6 = scmp.lt.u32.totalorder %s2971_s21, %s2967_s25  ;;  %p2975_p5 = scmp.lt.u32.totalorder %s2967_s25, %s3623_s22 }
 0x867   : > { %p2969_p10 = pnand %p2968_p8, %p3742_p2 }
 0x868   : > { %p2974_p3 = por %p2973_p6, %p2972_p1 }
 0x869   : > { %p2970_p0 = pneg %p2969_p10 }
 0x86a   : > { %p2976_p4 = por %p2975_p5, %p2974_p3 }
 0x86c   : > { %p2977_p11 = pnand %p2976_p4, %p2970_p0 }
 0x86e   : > { %2980 = shalt.err (!%p2977_p11)
}
 0x86f   : > { %s3051_s23 = smov 128  }
 0x870   : > { %2633 = dma.vmem_to_hbm [thread:$0]  (%p3742_p2), %s3618_s10, 256, %s3623_s22, %s2165_s16, %s3051_s23, %s3051_s23, %s3047_s12  }
 0x871 PF: > { %s3743_s14 = sld [smem:[#allocation20_spill]]  ;;  %s3744_s8 = sld [smem:[#allocation22_spill]] }
 0x872   : > { %s3745_s18 = sld [smem:[#allocation21_spill]] }
 0x877   : > { %s2193_s1 = sand.u32 1, %s3743_s14   ;;  %p3746_p13 = scmp.ne.s32.totalorder %s3744_s8, 0 }
 0x878   : > { %p3747_p7 = scmp.ge.s32.totalorder %s3745_s18, 2  ;;  %s2194_s24 = scalar_lea.sflag [#allocation4], %s2193_s1 }
 0x87a   : > { %p2659_p9 = pnand %p3747_p7, %p3746_p13 }
 0x87c   : > { %3014 = dma.done.wait (!%p2659_p9), %s2194_s24, 256  }
 0x87d   : > { %3016 = vsyncadd (!%p2659_p9), %s2194_s24, 4294967040  ;;  %s3748_s30 = sld [smem:[#allocation23_spill]]  ;;  %s3749_s17 = sld [smem:[#allocation25_spill]] }
 0x87e   : > { %s3750_s27 = smov %s3023_s28  ;;  %s3751_s28 = smov %s3027_s29 }
 0x883   : > { %p26_p12 = scmp.ge.s32.totalorder %s3748_s30, 4   ;;  %s3752_s29 = smov %s3749_s17 }
 0x885   :  { %28 = sbr.rel (!%p26_p12) target bundleno = 14 (0xe), region = 137 }
 0x88c   :  { %2199 = vsyncpa [#allocation3], 1 }
 0x88d   :  { %2201 = vsyncpa [#allocation3 + $0x1], 1 }
 0x88e   :  { %2202 = vsyncpa [#allocation6], 1 }
 0x88f   :  { %2204 = vsyncpa [#allocation6 + $0x1], 1 }
 0x890   :  { %2205 = vsyncpa [#allocation9], 1 }
 0x891   :  { %2206 = vsyncpa [#allocation12], 1 }
 0x892   :  { %2207 = vsyncpa [#allocation4], 1 }
 0x893   :  { %2209 = vsyncpa [#allocation4 + $0x1], 1 }

</bundles_post_ra>
